<compile_context>
chip_gen: v7x
topology: tpu7x:2x2x1
jax: 0.10.0
libtpu: 0.0.40
codegen_flags: <defaults>
</compile_context>

<pallas_src>
import jax
import jax.numpy as jnp
from jax.experimental import pallas as pl
from jax.experimental.pallas import tpu as pltpu


def _round_up(a, b):
    return (a + b - 1) // b * b


def _make_kernel(dims_pad, out_rows):
    """Build the fused 8-layer kernel for a given padded channel chain."""
    n_layers = len(dims_pad) - 1

    def kernel(x_ref, w_ref, b_ref, out_ref):
        # x_ref:   (cin0, TN)       f32 activation tile (points on the lane axis)
        # w_ref:   (8, Cmax, Cmax)  BN-folded weights (grid-invariant, VMEM-resident)
        # b_ref:   (8, Cmax, 1)     BN-folded biases (f32)
        # out_ref: (out_rows, TN)   f32 output tile (lane-dense stores)
        cdt = w_ref.dtype
        h = x_ref[...].astype(cdt)                       # in-kernel f32 -> bf16 cast
        for li in range(n_layers):                       # unrolled chain of MXU matmuls
            cin, cout = dims_pad[li], dims_pad[li + 1]
            w = w_ref[li, :cout, :cin]                   # static sub-slice, no padding waste
            b = b_ref[li, :cout, :]                      # (cout, 1), broadcast over lanes
            acc = jnp.dot(w, h, preferred_element_type=jnp.float32) + b
            if li < n_layers - 1:
                h = jnp.maximum(acc, 0.0).astype(cdt)    # ReLU(BN(conv_i)), back to bf16
            else:
                h = jnp.tanh(acc)                        # tanh on only (8, TN) rows
        out_ref[...] = h[:out_rows, :].astype(out_ref.dtype)

    return kernel


def pack_params(params, compute_dtype=jnp.bfloat16):
    """Stack per-layer (W (Cout, Cin), b (Cout,)) params into zero-padded slabs.

    Returns (w_slab, b_slab, dims_pad): dims_pad[i] is layer i's input channel count
    rounded to 16 (bf16 sublane packing); the final output rows are rounded to 8 (f32).
    Zero padding is semantics-preserving: padded rows stay exactly 0 through ReLU and
    padded weight columns are 0, so they never contaminate valid channels.
    """
    n = len(params)
    dims = [params[0][0].shape[1]] + [w.shape[0] for w, _ in params]
    for li in range(1, n):
        assert params[li][0].shape[1] == dims[li], "layer channel chain mismatch"
    dims_pad = [_round_up(d, 16) for d in dims]
    dims_pad[-1] = _round_up(dims[-1], 8)                # last layer: f32 acc, 3 kept rows
    cmax = max(dims_pad)

    w_slab = jnp.zeros((n, cmax, cmax), compute_dtype)
    b_slab = jnp.zeros((n, cmax, 1), jnp.float32)
    for li, (w, b) in enumerate(params):
        cout, cin = w.shape
        w_slab = w_slab.at[li, :cout, :cin].set(w.astype(compute_dtype))
        b_slab = b_slab.at[li, :cout, 0].set(b.astype(jnp.float32))
    return w_slab, b_slab, tuple(dims_pad), dims[-1]


def deformnet_layer8_forward(x_bcn, params, drp_idx=None, *,
                             tile_n=2048, compute_dtype=jnp.bfloat16):
    """x_bcn: (B, C, N) float32 (PyTorch NCW). drp_idx is unused (as in the module).

    Returns (B, 3, N) float32, matching PyTorch Conv1d output layout (no transposes,
    no post-slicing: the N remainder is handled by Pallas partial blocks).
    """
    del drp_idx  # unused by the reference forward
    B, C, N = x_bcn.shape

    w_slab, b_slab, dims_pad, out_rows = pack_params(params, compute_dtype)
    cin0 = dims_pad[0]
    assert C <= cin0, "input channels exceed packed slab"
    if C < cin0:
        # Rare path (C not a multiple of 16): one-off channel zero-pad.
        x_bcn = jnp.pad(x_bcn, ((0, 0), (0, cin0 - C), (0, 0)))

    # Lane-aligned point tile; large tiles amortize per-step overhead.
    tile = min(_round_up(tile_n, 128), _round_up(N, 128))
    if B == 1:
        # Guarantee >= 2 parallel grid steps so both v7x TensorCores get work
        # (no-op for N <= 128; irrelevant on 1-TC v5e/v6e).
        tile = min(tile, max(128, _round_up(pl.cdiv(N, 2), 128)))
    n_blocks = pl.cdiv(N, tile)

    kernel = _make_kernel(dims_pad, out_rows)

    out = pl.pallas_call(
        kernel,
        out_shape=jax.ShapeDtypeStruct((B, out_rows, N), jnp.float32),
        grid=(B, n_blocks),
        in_specs=[
            pl.BlockSpec((pl.Squeezed(), cin0, tile), lambda b, j: (b, 0, j)),
            pl.BlockSpec(w_slab.shape, lambda b, j: (0, 0, 0)),
            pl.BlockSpec(b_slab.shape, lambda b, j: (0, 0, 0)),
        ],
        out_specs=pl.BlockSpec((pl.Squeezed(), out_rows, tile), lambda b, j: (b, 0, j)),
        compiler_params=pltpu.CompilerParams(
            dimension_semantics=("parallel", "parallel")),
    )(x_bcn, w_slab, b_slab)

    return out


def reference_forward(x_bcn, params):
    """Pure-JAX f32 reference with the same (eval-mode BN-folded) parameters."""
    h = x_bcn
    n = len(params)
    for li, (w, b) in enumerate(params):
        h = jnp.einsum('oc,bcn->bon', w, h,
                       precision=jax.lax.Precision.HIGHEST,
                       preferred_element_type=jnp.float32) + b[None, :, None]
        h = jnp.maximum(h, 0.0) if li < n - 1 else jnp.tanh(h)
    return h


def make_params(key, bottleneck_size=64, eps=1e-5):
    """Deterministic synthetic parameters; BN folded into conv weights (eval-mode)."""
    bsz = bottleneck_size
    dims = [
        bsz,                                   # input
        bsz,                                   # conv1
        bsz // 2 + bsz // 4 + bsz // 8,        # conv2
        bsz // 2 + bsz // 4,                   # conv3
        bsz // 2,                              # conv4
        bsz // 4 + bsz // 8,                   # conv5
        bsz // 4,                              # conv6
        bsz // 8,                              # conv7
        3,                                     # conv8
    ]
    params = []
    layer_keys = jax.random.split(key, 8)
    for li in range(8):
        cin, cout = dims[li], dims[li + 1]
        k_w, k_b, k_g, k_be, k_m = jax.random.split(layer_keys[li], 5)
        bound = 1.0 / jnp.sqrt(jnp.float32(cin))
        W = jax.random.uniform(k_w, (cout, cin), jnp.float32, -bound, bound)
        bias = jax.random.uniform(k_b, (cout,), jnp.float32, -bound, bound)
        if li < 7:  # conv1..conv7 are followed by BatchNorm1d
            gamma = 1.0 + 0.1 * jax.random.normal(k_g, (cout,), jnp.float32)
            beta = 0.1 * jax.random.normal(k_be, (cout,), jnp.float32)
            run_mean = 0.1 * jax.random.normal(k_m, (cout,), jnp.float32)
            run_var = jnp.ones((cout,), jnp.float32)
            scale = gamma / jnp.sqrt(run_var + eps)
            W_f = W * scale[:, None]
            b_f = (bias - run_mean) * scale + beta
        else:
            W_f, b_f = W, bias
        params.append((W_f, b_f))   # W stored (Cout, Cin): kernel computes W @ h
    return params


if __name__ == "__main__":
    key = jax.random.PRNGKey(0)
    k_param, k_x = jax.random.split(key)

    bottleneck_size = 64   # small, forward-consistent (divisible by 8)
    B, N = 2, 300          # N deliberately NOT a multiple of 128 -> exercises partial blocks

    params = make_params(k_param, bottleneck_size=bottleneck_size)
    x = jax.random.normal(k_x, (B, bottleneck_size, N), jnp.float32)  # NCW like PyTorch
    drp_idx = jnp.zeros((B,), jnp.int32)  # unused by forward, kept for signature parity

    # Correctness check: f32 kernel path vs pure-JAX reference.
    y_f32 = jax.block_until_ready(
        deformnet_layer8_forward(x, params, drp_idx, compute_dtype=jnp.float32))
    y_ref = jax.block_until_ready(reference_forward(x, params))
    assert y_f32.shape == (B, 3, N), y_f32.shape
    assert float(jnp.max(jnp.abs(y_f32 - y_ref))) < 5e-2

    # Fast bf16 path (default).
    y = jax.block_until_ready(deformnet_layer8_forward(x, params, drp_idx))
    assert y.shape == (B, 3, N), y.shape
    assert bool(jnp.all(jnp.isfinite(y)))
    assert bool(jnp.all(jnp.abs(y) <= 1.0))  # tanh output range
    print("KERNEL_OK")
</pallas_src>

<mosaic_0001>
module attributes {stable_mosaic.version = 11 : i64} {
  func.func @kernel(%arg0: i32, %arg1: i32, %arg2: memref<1x64x384xf32, #tpu.memory_space<vmem>>, %arg3: memref<8x64x64xf32, #tpu.memory_space<vmem>>, %arg4: memref<8x64x1xf32, #tpu.memory_space<vmem>>, %arg5: memref<1x3x384xf32, #tpu.memory_space<vmem>>) attributes {dimension_semantics = [#tpu.dimension_semantics<parallel>, #tpu.dimension_semantics<parallel>], iteration_bounds = array<i64: 2, 1>, scalar_prefetch = 0 : i64, scratch_operands = 0 : i64, tpu.core_type = #tpu.core_type<tc>, window_params = [{transform_indices = @transform_0, window_bounds = array<i64: 1, 64, 384>}, {pipeline_mode = #tpu.pipeline_mode<synchronous>, transform_indices = @transform_1, window_bounds = array<i64: 8, 64, 64>}, {pipeline_mode = #tpu.pipeline_mode<synchronous>, transform_indices = @transform_2, window_bounds = array<i64: 8, 64, 1>}, {transform_indices = @transform_3, window_bounds = array<i64: 1, 3, 384>}]} {
    %c0 = arith.constant 0 : index
    %c0_0 = arith.constant 0 : index
    %c0_1 = arith.constant 0 : index
    %0 = vector.load %arg2[%c0, %c0_0, %c0_1] : memref<1x64x384xf32, #tpu.memory_space<vmem>>, vector<1x64x384xf32>
    %1 = vector.shape_cast %0 : vector<1x64x384xf32> to vector<64x384xf32>
    %c0_2 = arith.constant 0 : index
    %c0_3 = arith.constant 0 : index
    %c0_4 = arith.constant 0 : index
    %2 = vector.load %arg3[%c0_2, %c0_3, %c0_4] : memref<8x64x64xf32, #tpu.memory_space<vmem>>, vector<1x64x64xf32>
    %3 = vector.shape_cast %2 : vector<1x64x64xf32> to vector<64x64xf32>
    %c0_5 = arith.constant 0 : index
    %c0_6 = arith.constant 0 : index
    %c0_7 = arith.constant 0 : index
    %4 = vector.load %arg4[%c0_5, %c0_6, %c0_7] : memref<8x64x1xf32, #tpu.memory_space<vmem>>, vector<1x64x1xf32>
    %5 = vector.shape_cast %4 : vector<1x64x1xf32> to vector<64x1xf32>
    %cst = arith.constant dense<0.000000e+00> : vector<64x384xf32>
    %6 = tpu.matmul %3, %1, %cst {dimension_numbers = #tpu.dot_dimension_numbers<[1], [0], [0], [1], [0, 0, 1, 1], [], []>} : vector<64x64xf32>, vector<64x384xf32>, vector<64x384xf32> -> vector<64x384xf32>
    %7 = vector.broadcast %5 : vector<64x1xf32> to vector<64x384xf32>
    %8 = arith.addf %6, %7 : vector<64x384xf32>
    %cst_8 = arith.constant 0.000000e+00 : f32
    %9 = vector.broadcast %cst_8 : f32 to vector<64x384xf32>
    %10 = arith.maximumf %8, %9 : vector<64x384xf32>
    %c1 = arith.constant 1 : index
    %c0_9 = arith.constant 0 : index
    %c0_10 = arith.constant 0 : index
    %11 = vector.load %arg3[%c1, %c0_9, %c0_10] : memref<8x64x64xf32, #tpu.memory_space<vmem>>, vector<1x64x64xf32>
    %12 = vector.shape_cast %11 : vector<1x64x64xf32> to vector<64x64xf32>
    %c1_11 = arith.constant 1 : index
    %c0_12 = arith.constant 0 : index
    %c0_13 = arith.constant 0 : index
    %13 = vector.load %arg4[%c1_11, %c0_12, %c0_13] : memref<8x64x1xf32, #tpu.memory_space<vmem>>, vector<1x64x1xf32>
    %14 = vector.shape_cast %13 : vector<1x64x1xf32> to vector<64x1xf32>
    %cst_14 = arith.constant dense<0.000000e+00> : vector<64x384xf32>
    %15 = tpu.matmul %12, %10, %cst_14 {dimension_numbers = #tpu.dot_dimension_numbers<[1], [0], [0], [1], [0, 0, 1, 1], [], []>} : vector<64x64xf32>, vector<64x384xf32>, vector<64x384xf32> -> vector<64x384xf32>
    %16 = vector.broadcast %14 : vector<64x1xf32> to vector<64x384xf32>
    %17 = arith.addf %15, %16 : vector<64x384xf32>
    %cst_15 = arith.constant 0.000000e+00 : f32
    %18 = vector.broadcast %cst_15 : f32 to vector<64x384xf32>
    %19 = arith.maximumf %17, %18 : vector<64x384xf32>
    %c2 = arith.constant 2 : index
    %c0_16 = arith.constant 0 : index
    %c0_17 = arith.constant 0 : index
    %20 = vector.load %arg3[%c2, %c0_16, %c0_17] : memref<8x64x64xf32, #tpu.memory_space<vmem>>, vector<1x48x64xf32>
    %21 = vector.shape_cast %20 : vector<1x48x64xf32> to vector<48x64xf32>
    %c2_18 = arith.constant 2 : index
    %c0_19 = arith.constant 0 : index
    %c0_20 = arith.constant 0 : index
    %22 = vector.load %arg4[%c2_18, %c0_19, %c0_20] : memref<8x64x1xf32, #tpu.memory_space<vmem>>, vector<1x48x1xf32>
    %23 = vector.shape_cast %22 : vector<1x48x1xf32> to vector<48x1xf32>
    %cst_21 = arith.constant dense<0.000000e+00> : vector<48x384xf32>
    %24 = tpu.matmul %21, %19, %cst_21 {dimension_numbers = #tpu.dot_dimension_numbers<[1], [0], [0], [1], [0, 0, 1, 1], [], []>} : vector<48x64xf32>, vector<64x384xf32>, vector<48x384xf32> -> vector<48x384xf32>
    %25 = vector.broadcast %23 : vector<48x1xf32> to vector<48x384xf32>
    %26 = arith.addf %24, %25 : vector<48x384xf32>
    %cst_22 = arith.constant 0.000000e+00 : f32
    %27 = vector.broadcast %cst_22 : f32 to vector<48x384xf32>
    %28 = arith.maximumf %26, %27 : vector<48x384xf32>
    %c3 = arith.constant 3 : index
    %c0_23 = arith.constant 0 : index
    %c0_24 = arith.constant 0 : index
    %29 = vector.load %arg3[%c3, %c0_23, %c0_24] : memref<8x64x64xf32, #tpu.memory_space<vmem>>, vector<1x32x48xf32>
    %30 = vector.shape_cast %29 : vector<1x32x48xf32> to vector<32x48xf32>
    %c3_25 = arith.constant 3 : index
    %c0_26 = arith.constant 0 : index
    %c0_27 = arith.constant 0 : index
    %31 = vector.load %arg4[%c3_25, %c0_26, %c0_27] : memref<8x64x1xf32, #tpu.memory_space<vmem>>, vector<1x32x1xf32>
    %32 = vector.shape_cast %31 : vector<1x32x1xf32> to vector<32x1xf32>
    %cst_28 = arith.constant dense<0.000000e+00> : vector<32x384xf32>
    %33 = tpu.matmul %30, %28, %cst_28 {dimension_numbers = #tpu.dot_dimension_numbers<[1], [0], [0], [1], [0, 0, 1, 1], [], []>} : vector<32x48xf32>, vector<48x384xf32>, vector<32x384xf32> -> vector<32x384xf32>
    %34 = vector.broadcast %32 : vector<32x1xf32> to vector<32x384xf32>
    %35 = arith.addf %33, %34 : vector<32x384xf32>
    %cst_29 = arith.constant 0.000000e+00 : f32
    %36 = vector.broadcast %cst_29 : f32 to vector<32x384xf32>
    %37 = arith.maximumf %35, %36 : vector<32x384xf32>
    %c4 = arith.constant 4 : index
    %c0_30 = arith.constant 0 : index
    %c0_31 = arith.constant 0 : index
    %38 = vector.load %arg3[%c4, %c0_30, %c0_31] : memref<8x64x64xf32, #tpu.memory_space<vmem>>, vector<1x32x32xf32>
    %39 = vector.shape_cast %38 : vector<1x32x32xf32> to vector<32x32xf32>
    %c4_32 = arith.constant 4 : index
    %c0_33 = arith.constant 0 : index
    %c0_34 = arith.constant 0 : index
    %40 = vector.load %arg4[%c4_32, %c0_33, %c0_34] : memref<8x64x1xf32, #tpu.memory_space<vmem>>, vector<1x32x1xf32>
    %41 = vector.shape_cast %40 : vector<1x32x1xf32> to vector<32x1xf32>
    %cst_35 = arith.constant dense<0.000000e+00> : vector<32x384xf32>
    %42 = tpu.matmul %39, %37, %cst_35 {dimension_numbers = #tpu.dot_dimension_numbers<[1], [0], [0], [1], [0, 0, 1, 1], [], []>} : vector<32x32xf32>, vector<32x384xf32>, vector<32x384xf32> -> vector<32x384xf32>
    %43 = vector.broadcast %41 : vector<32x1xf32> to vector<32x384xf32>
    %44 = arith.addf %42, %43 : vector<32x384xf32>
    %cst_36 = arith.constant 0.000000e+00 : f32
    %45 = vector.broadcast %cst_36 : f32 to vector<32x384xf32>
    %46 = arith.maximumf %44, %45 : vector<32x384xf32>
    %c5 = arith.constant 5 : index
    %c0_37 = arith.constant 0 : index
    %c0_38 = arith.constant 0 : index
    %47 = vector.load %arg3[%c5, %c0_37, %c0_38] : memref<8x64x64xf32, #tpu.memory_space<vmem>>, vector<1x16x32xf32>
    %48 = vector.shape_cast %47 : vector<1x16x32xf32> to vector<16x32xf32>
    %c5_39 = arith.constant 5 : index
    %c0_40 = arith.constant 0 : index
    %c0_41 = arith.constant 0 : index
    %49 = vector.load %arg4[%c5_39, %c0_40, %c0_41] : memref<8x64x1xf32, #tpu.memory_space<vmem>>, vector<1x16x1xf32>
    %50 = vector.shape_cast %49 : vector<1x16x1xf32> to vector<16x1xf32>
    %cst_42 = arith.constant dense<0.000000e+00> : vector<16x384xf32>
    %51 = tpu.matmul %48, %46, %cst_42 {dimension_numbers = #tpu.dot_dimension_numbers<[1], [0], [0], [1], [0, 0, 1, 1], [], []>} : vector<16x32xf32>, vector<32x384xf32>, vector<16x384xf32> -> vector<16x384xf32>
    %52 = vector.broadcast %50 : vector<16x1xf32> to vector<16x384xf32>
    %53 = arith.addf %51, %52 : vector<16x384xf32>
    %cst_43 = arith.constant 0.000000e+00 : f32
    %54 = vector.broadcast %cst_43 : f32 to vector<16x384xf32>
    %55 = arith.maximumf %53, %54 : vector<16x384xf32>
    %c6 = arith.constant 6 : index
    %c0_44 = arith.constant 0 : index
    %c0_45 = arith.constant 0 : index
    %56 = vector.load %arg3[%c6, %c0_44, %c0_45] : memref<8x64x64xf32, #tpu.memory_space<vmem>>, vector<1x16x16xf32>
    %57 = vector.shape_cast %56 : vector<1x16x16xf32> to vector<16x16xf32>
    %c6_46 = arith.constant 6 : index
    %c0_47 = arith.constant 0 : index
    %c0_48 = arith.constant 0 : index
    %58 = vector.load %arg4[%c6_46, %c0_47, %c0_48] : memref<8x64x1xf32, #tpu.memory_space<vmem>>, vector<1x16x1xf32>
    %59 = vector.shape_cast %58 : vector<1x16x1xf32> to vector<16x1xf32>
    %cst_49 = arith.constant dense<0.000000e+00> : vector<16x384xf32>
    %60 = tpu.matmul %57, %55, %cst_49 {dimension_numbers = #tpu.dot_dimension_numbers<[1], [0], [0], [1], [0, 0, 1, 1], [], []>} : vector<16x16xf32>, vector<16x384xf32>, vector<16x384xf32> -> vector<16x384xf32>
    %61 = vector.broadcast %59 : vector<16x1xf32> to vector<16x384xf32>
    %62 = arith.addf %60, %61 : vector<16x384xf32>
    %cst_50 = arith.constant 0.000000e+00 : f32
    %63 = vector.broadcast %cst_50 : f32 to vector<16x384xf32>
    %64 = arith.maximumf %62, %63 : vector<16x384xf32>
    %c7 = arith.constant 7 : index
    %c0_51 = arith.constant 0 : index
    %c0_52 = arith.constant 0 : index
    %65 = vector.load %arg3[%c7, %c0_51, %c0_52] : memref<8x64x64xf32, #tpu.memory_space<vmem>>, vector<1x8x16xf32>
    %66 = vector.shape_cast %65 : vector<1x8x16xf32> to vector<8x16xf32>
    %c7_53 = arith.constant 7 : index
    %c0_54 = arith.constant 0 : index
    %c0_55 = arith.constant 0 : index
    %67 = vector.load %arg4[%c7_53, %c0_54, %c0_55] : memref<8x64x1xf32, #tpu.memory_space<vmem>>, vector<1x8x1xf32>
    %68 = vector.shape_cast %67 : vector<1x8x1xf32> to vector<8x1xf32>
    %cst_56 = arith.constant dense<0.000000e+00> : vector<8x384xf32>
    %69 = tpu.matmul %66, %64, %cst_56 {dimension_numbers = #tpu.dot_dimension_numbers<[1], [0], [0], [1], [0, 0, 1, 1], [], []>} : vector<8x16xf32>, vector<16x384xf32>, vector<8x384xf32> -> vector<8x384xf32>
    %70 = vector.broadcast %68 : vector<8x1xf32> to vector<8x384xf32>
    %71 = arith.addf %69, %70 : vector<8x384xf32>
    %72 = math.tanh %71 : vector<8x384xf32>
    %73 = vector.extract_strided_slice %72 {offsets = [0, 0], sizes = [3, 384], strides = [1, 1]} : vector<8x384xf32> to vector<3x384xf32>
    %c0_57 = arith.constant 0 : index
    %c0_58 = arith.constant 0 : index
    %c0_59 = arith.constant 0 : index
    %74 = vector.load %arg5[%c0_57, %c0_58, %c0_59] : memref<1x3x384xf32, #tpu.memory_space<vmem>>, vector<1x3x384xf32>
    %75 = vector.shape_cast %74 : vector<1x3x384xf32> to vector<3x384xf32>
    %76 = vector.shape_cast %73 : vector<3x384xf32> to vector<1x3x384xf32>
    tpu.vector_store %arg5[%c0_57, %c0_58, %c0_59], %76 {strides = array<i32>} : memref<1x3x384xf32, #tpu.memory_space<vmem>>, vector<1x3x384xf32>,
    return
  }
  func.func @transform_0(%arg0: i32, %arg1: i32) -> (i32, i32, i32) {
    %c0_i32 = arith.constant 0 : i32
    %c0_i32_0 = arith.constant 0 : i32
    return %arg0, %c0_i32, %arg1 : i32, i32, i32
  }
  func.func @transform_1(%arg0: i32, %arg1: i32) -> (i32, i32, i32) {
    %c0_i32 = arith.constant 0 : i32
    %c0_i32_0 = arith.constant 0 : i32
    %c0_i32_1 = arith.constant 0 : i32
    %c0_i32_2 = arith.constant 0 : i32
    return %c0_i32, %c0_i32_0, %c0_i32_1 : i32, i32, i32
  }
  func.func @transform_2(%arg0: i32, %arg1: i32) -> (i32, i32, i32) {
    %c0_i32 = arith.constant 0 : i32
    %c0_i32_0 = arith.constant 0 : i32
    %c0_i32_1 = arith.constant 0 : i32
    %c0_i32_2 = arith.constant 0 : i32
    return %c0_i32, %c0_i32_0, %c0_i32_1 : i32, i32, i32
  }
  func.func @transform_3(%arg0: i32, %arg1: i32) -> (i32, i32, i32) {
    %c0_i32 = arith.constant 0 : i32
    %c0_i32_0 = arith.constant 0 : i32
    return %arg0, %c0_i32, %arg1 : i32, i32, i32
  }
}

</mosaic_0001>

<bundles_post_ra>
// kernel: tpu_custom_call.1
= control target key start
LH: loop header
LB: loop body
LE: loop exit
PB: predicated region body
PF: predicated region fallthrough
CT: control target
= control target key end

     0   :  { %8 = vsyncpa [#allocation3], 0  ;;  %s3463_s0 = inlined_call_operand.hbm [shape: f32[2,64,300], index: 0, kind: input, shape index: {}]   ;;  %s3464_s1 = inlined_call_operand.vmem [shape: f32[8,64,64], index: 1, kind: input, shape index: {}]   ;;  %s3465_s2 = inlined_call_operand.vmem [shape: f32[8,64,1], index: 2, kind: input, shape index: {}]   ;;  %s3466_s3 = inlined_call_operand.vmem [shape: f32[2,3,300], index: 3, kind: output, shape index: {}]  }
   0x1   :  { %10 = vsyncpa [#allocation3 + $0x1], 0  ;;  %s2939_s12 = smov 0   ;;  %s2941_s13 = smov 0  }
   0x2   :  { %s2943_s14 = smov 0   ;;  %s2945_s15 = smov 0  }
   0x3   :  { %s2947_s16 = smov 0   ;;  %s2949_s17 = smov 0  }
   0x4 LB: > { %s2242_s18 = sadd.s32 4294967295, %s2910_s17   ;;  %s28_s19 = sadd.s32 1, %s2906_s16  ;;  %s2910_s17 = sphi %s2949_s17, %s16_s17   ;;  %s2906_s16 = sphi %s2947_s16, %s3473_s16   ;;  %s2902_s15 = sphi %s2945_s15, %s3472_s15   ;;  %s2898_s14 = sphi %s2943_s14, %s3471_s14   ;;  %s2894_s13 = sphi %s2941_s13, %s3470_s13   ;;  %s2890_s12 = sphi %s2939_s12, %s3469_s12  }
   0x5   : > { %p30_p0 = scmp.ge.s32.totalorder %s28_s19, 2  ;;  %s37_s20 = sadd.s32 1, %s2898_s14 }
   0x6   : > { %p44_p1 = scmp.ne.s32.totalorder %s2898_s14, %s2894_s13  ;;  %p45_p2 = scmp.eq.s32.totalorder %s2910_s17, 0 }
   0x7   : > { %s3475_s19 = smov (%p30_p0, %s28_s19), 0  ;;  %p50_p4 = scmp.ne.s32.totalorder %s2894_s13, %s2890_s12 }
   0x8   : > { %p46_p3 = por %p45_p2, %p44_p1  ;;  %s32_s21 = ssub.s32 %s2906_s16, %s3475_s19 }
   0x9   : > { %p51_p5 = scmp.eq.s32.totalorder %s2242_s18, 0  ;;  %p35_p6 = scmp.eq.s32.totalorder %s32_s21, 0 }
   0xa   : > { %p2767_p8 = scmp.lt.s32.totalorder %s2910_s17, 2  ;;  %s150_s24 = sand.u32 1, %s2898_s14  }
   0xb   : > { %p2978_p7 = por %p51_p5, %p50_p4  ;;  %s2758_s25 = smul.u32 3072, %s2906_s16 }
   0xc   : > { %s2984_s23 = scalar_select %p35_p6, %s2898_s14, %s37_s20  }
   0xd   : > { %s2757_s26 = smul.u32 192, %s150_s24  ;;  %s2991_s29 = scalar_lea.hbm %s3463_s0, %s2758_s25 }
   0xe   : > { %p2993_p9 = pnand %p2767_p8, %p46_p3  ;;  %s2999_s6 = scalar_lea.sflag [#allocation3], %s150_s24 }
   0xf   : > { %s154_s4 = scalar_lea.vmem [#allocation2], %s2757_s26  ;;  %s2830_s7 = scalar_lea.hbm %s2991_s29, 3072 }
  0x10   : > { %s163_s5 = sshll.u32 %s154_s4, 4  ;;  %p2831_p10 = scmp.ne.s32.totalorder %s2991_s29, %s2830_s7  ;;  %s2997_s5 = int_to_ptr.vmem [resolvable:$true] %s163_s5 }
  0x11   : > { %p2832_p11 = pneg %p2993_p9  ;;  %s2835_s10 = scalar_lea.hbm %s3463_s0, 6144 }
  0x12   : > { %p2836_p0 = scmp.lt.u32.totalorder %s2991_s29, %s3463_s0  ;;  %p2837_p1 = scmp.lt.u32.totalorder %s2835_s10, %s2830_s7 }
  0x13   : > { %p2833_p12 = pnand %p2832_p11, %p2831_p10  ;;  %p2839_p3 = scmp.lt.u32.totalorder %s2830_s7, %s2991_s29 }
  0x14   : > { %p2838_p2 = por %p2837_p1, %p2836_p0 }
  0x15   : > { %p2834_p13 = pneg %p2833_p12 }
  0x16   : > { %p2840_p4 = por %p2839_p3, %p2838_p2 }
  0x18   : > { %p2841_p5 = pnand %p2840_p4, %p2834_p13 }
  0x1a   : > { %2844 = shalt.err (!%p2841_p5)
}
  0x1b   : > { %s2845_s18 = scalar_lea.vmem %s2997_s5, 3072  ;;  %s2912_s20 = smov [#allocation2]  }
  0x1c   : > { %p2846_p6 = scmp.ne.s32.totalorder %s2997_s5, %s2845_s18  ;;  %s2850_s21 = sshll.u32 %s2912_s20, 4  ;;  %s2851_s21 = int_to_ptr.vmem [resolvable:$false] %s2850_s21 }
  0x1d   : > { %s2852_s24 = scalar_lea.vmem %s2851_s21, 6144  ;;  %p2853_p12 = scmp.lt.s32.totalorder %s2997_s5, %s2851_s21 }
  0x1e   : > { %p2848_p8 = pnand %p2846_p6, %p2832_p11  ;;  %p2854_p0 = scmp.lt.s32.totalorder %s2852_s24, %s2845_s18 }
  0x20   : > { %p2849_p10 = pneg %p2848_p8  ;;  %p2855_p1 = por %p2854_p0, %p2853_p12 }
  0x22   : > { %p2856_p2 = pnand %p2855_p1, %p2849_p10 }
  0x24   : > { %2859 = shalt.err (!%p2856_p2)
}
  0x25   : > { %s2913_s25 = smov 384   ;;  %s2914_s26 = smov 24  }
  0x26   : > { %2766 = dma.hbm_to_vmem [thread:$0]  (!%p2993_p9), %s2991_s29, 3072, %s2997_s5, %s2999_s6, %s2913_s25, %s2913_s25, %s2914_s26  }
  0x27   : > { %p2247_p11 = scmp.ge.s32.totalorder %s2910_s17, 1  ;;  %p171_p13 = scmp.lt.s32.totalorder %s2910_s17, 3 }
  0x29   : > { %p172_p3 = pnand %p2247_p11, %p171_p13 }
  0x2a   : > { %s177_s27 = sand.u32 (!%p172_p3), 1, %s2894_s13  }
  0x2b   : > { %175 = sbr.rel (%p172_p3) target bundleno = 1969 (0x7b1), region = 32  ;;  %s178_s4 = scalar_lea.sflag (!%p172_p3), [#allocation3], %s177_s27 }
  0x2c   : > { %s2759_s28 = smul.u32 (!%p172_p3), 192, %s177_s27 }
  0x2e   : > { %s3030_s7 = scalar_lea.vmem (!%p172_p3), [#allocation2], %s2759_s28 }
  0x32   : > { %2885 = dma.done.wait (%p2978_p7), %s178_s4, 3072  }
  0x33   : > { %2887 = vsyncadd (%p2978_p7), %s178_s4, 4294964224  ;;  %v2915_v0 = vmov 0.0   ;;  %v2916_v1 = vmov 0   ;;  %v220_v2 = vld [vmem:[%s3030_s7 + $0x8] sm:$0xff]  ;;  %v223_v3 = vld [vmem:[%s3030_s7 + $0x20] sm:$0xff]  ;;  %vm299_vm0 = vcmask 523264  }
  0x34   : > { %388 = vmatprep.mubr.f32.mxu0 %v2915_v0  ;;  %2822 = vset.pattern.permute.xlu0 %v2916_v1  ;;  %v221_v4 = vld [vmem:[%s3030_s7 + $0x10] sm:$0xff]  ;;  %v2590_v5 = vpack.c.bf16 %v223_v3, %v220_v2  ;;  %v224_v6 = vld [vmem:[%s3030_s7 + $0x28] sm:$0xff]  ;;  %v219_v7 = vld [vmem:[%s3030_s7] sm:$0xff]  ;;  %vm1196_vm1 = vcmask 392192   ;;  %vm1425_vm2 = vcmask 261120   ;;  %vm1820_vm3 = vcmask 130048  }
  0x35   : > { %2823 = vset.pattern.permute.xlu1 %v2916_v1  ;;  %v222_v8 = vld [vmem:[%s3030_s7 + $0x18] sm:$0xff]  ;;  %v2606_v9 = vpack.c.bf16 %v224_v6, %v221_v4  ;;  %v229_v12 = vld [vmem:[%s3030_s7 + $0x50] sm:$0xff]  ;;  %v227_v13 = vld [vmem:[%s3030_s7 + $0x40] sm:$0xff]  ;;  %vm2918_vm4 = vmmov 0   ;;  %p210_p7 = scmp.lt.s32.totalorder %s2902_s15, 1 }
  0x36   : > { %v2592_v10 = vpack.c.bf16 %v222_v8, %v219_v7  ;;  %v226_v11 = vld [vmem:[%s3030_s7 + $0x38] sm:$0xff]  ;;  %2591 = vmatprep.subr.bf16.mxu0 %v2590_v5  ;;  %v225_v16 = vld [vmem:[%s3030_s7 + $0x30] sm:$0xff]  ;;  %v228_v17 = vld [vmem:[%s3030_s7 + $0x48] sm:$0xff] }
  0x37   : > { %v2594_v14 = vpack.c.bf16 %v229_v12, %v226_v11  ;;  %v230_v15 = vld [vmem:[%s3030_s7 + $0x58] sm:$0xff]  ;;  %2607 = vmatprep.subr.bf16.mxu1 %v2606_v9  ;;  %v2596_v19 = vpack.c.bf16 %v228_v17, %v225_v16  ;;  %v232_v20 = vld [vmem:[%s3030_s7 + $0x68] sm:$0xff]  ;;  %v235_v21 = vld [vmem:[%s3030_s7 + $0x80] sm:$0xff]  ;;  %s3477_s15 = smov (!%p210_p7, %s2902_s15), 1 }
  0x38   : > { %2593 = vmatpush1.bf16.msra.mxu0 %v2592_v10  ;;  %v2610_v18 = vpack.c.bf16 %v230_v15, %v227_v13  ;;  %v233_v22 = vld [vmem:[%s3030_s7 + $0x70] sm:$0xff]  ;;  %2609 = vmatpush3.bf16.msra.mxu1 %v2606_v9  ;;  %v2598_v23 = vpack.c.bf16 %v235_v21, %v232_v20  ;;  %v236_v24 = vld [vmem:[%s3030_s7 + $0x88] sm:$0xff]  ;;  %v231_v25 = vld [vmem:[%s3030_s7 + $0x60] sm:$0xff]  ;;  %s2760_s22 = smul.u32 12, %s3477_s15 }
  0x39   : > { %2595 = vmatprep.subr.bf16.mxu0 %v2594_v14  ;;  %v234_v26 = vld [vmem:[%s3030_s7 + $0x78] sm:$0xff]  ;;  %v2614_v27 = vpack.c.bf16 %v236_v24, %v233_v22  ;;  %v241_v29 = vld [vmem:[%s3030_s7 + $0xb0] sm:$0xff]  ;;  %v239_v30 = vld [vmem:[%s3030_s7 + $0xa0] sm:$0xff] }
  0x3a   : > { %2611 = vmatprep.subr.bf16.mxu1 %v2610_v18  ;;  %v238_v28 = vld [vmem:[%s3030_s7 + $0x98] sm:$0xff]  ;;  %v2600_v32 = vpack.c.bf16 %v234_v26, %v231_v25  ;;  %v243_v33 = vld [vmem:[%s3464_s1] sm:$0xff]  ;;  %v237_v35 = vld [vmem:[%s3030_s7 + $0x90] sm:$0xff]  ;;  %s217_s5 = scalar_lea.vmem %s3466_s3, %s2760_s22 }
  0x3b   : > { %v242_v31 = vld [vmem:[%s3030_s7 + $0xb8] sm:$0xff]  ;;  %v2602_v34 = vpack.c.bf16 %v241_v29, %v238_v28  ;;  %v240_v36 = vld [vmem:[%s3030_s7 + $0xa8] sm:$0xff]  ;;  %2468 = vmatprep.mubr.msk.f32.mxu1 %vm299_vm0, %v243_v33  ;;  %v251_v38 = vld [vmem:[%s3465_s2] sm:$0xff] }
  0x3c   : > { %2597 = vmatpush1.bf16.msra.mxu0 %v2596_v19  ;;  %2613 = vmatpush3.bf16.msra.mxu1 %v2610_v18  ;;  %v2618_v37 = vpack.c.bf16 %v242_v31, %v239_v30  ;;  %v253_v39 = vld [vmem:[%s3465_s2 + $0x10] sm:$0xff]  ;;  %v2604_v40 = vpack.c.bf16 %v240_v36, %v237_v35  ;;  %v252_v41 = vld [vmem:[%s3465_s2 + $0x8] sm:$0xff]  ;;  %v254_v42 = vld [vmem:[%s3465_s2 + $0x18] sm:$0xff] }
  0x3d   : > { %2599 = vmatprep.subr.bf16.mxu0 %v2598_v23  ;;  %2615 = vmatprep.subr.bf16.mxu1 %v2614_v27  ;;  %v255_v43 = vld [vmem:[%s3465_s2 + $0x20] sm:$0xff]  ;;  %v244_v44 = vld [vmem:[%s3464_s1 + $0x8] sm:$0xff]  ;;  %v245_v45 = vld [vmem:[%s3464_s1 + $0x10] sm:$0xff] }
  0x3e   : > { %261 = vperm.xlu0 %2822, %v251_v38   ;;  %271 = vperm.xlu1 %2823, %v253_v39   ;;  %v256_v46 = vld [vmem:[%s3465_s2 + $0x28] sm:$0xff]  ;;  %v257_v47 = vld [vmem:[%s3465_s2 + $0x30] sm:$0xff]  ;;  %v246_v48 = vld [vmem:[%s3464_s1 + $0x18] sm:$0xff] }
  0x3f   : > { %v247_v49 = vld [vmem:[%s3464_s1 + $0x20] sm:$0xff]  ;;  %v258_v50 = vld [vmem:[%s3465_s2 + $0x38] sm:$0xff]  ;;  %v248_v52 = vld [vmem:[%s3464_s1 + $0x28] sm:$0xff] }
  0x40   : > { %2601 = vmatpush1.bf16.msra.mxu0 %v2600_v32  ;;  %2617 = vmatpush3.bf16.msra.mxu1 %v2614_v27  ;;  %v2273_v51 = vld [vmem:[%s3465_s2 + $0x40] sm:$0xff]  ;;  %v249_v53 = vld [vmem:[%s3464_s1 + $0x30] sm:$0xff]  ;;  %v2274_v54 = vld [vmem:[%s3465_s2 + $0x48] sm:$0xff] }
  0x41   : > { %2603 = vmatprep.subr.bf16.mxu0 %v2602_v34  ;;  %2619 = vmatprep.subr.bf16.mxu1 %v2618_v37  ;;  %v2275_v55 = vld [vmem:[%s3465_s2 + $0x50] sm:$0xff]  ;;  %v250_v56 = vld [vmem:[%s3464_s1 + $0x38] sm:$0xff]  ;;  %v2277_v58 = vld [vmem:[%s3465_s2 + $0x60] sm:$0xff] }
  0x42   : > { %266 = vperm.xlu0 %2822, %v252_v41   ;;  %276 = vperm.xlu1 %2823, %v254_v42   ;;  %v2276_v57 = vld [vmem:[%s3465_s2 + $0x58] sm:$0xff]  ;;  %v2278_v59 = vld [vmem:[%s3465_s2 + $0x68] sm:$0xff]  ;;  %v2279_v60 = vld [vmem:[%s3465_s2 + $0x70] sm:$0xff] }
  0x43   : > { %v2280_v61 = vld [vmem:[%s3465_s2 + $0x78] sm:$0xff]  ;;  %v2303_v62 = vld [vmem:[%s3465_s2 + $0x80] sm:$0xff]  ;;  %v2304_v63 = vld [vmem:[%s3465_s2 + $0x88] sm:$0xff] }
  0x44   : > { %2605 = vmatpush1.bf16.msra.mxu0 %v2604_v40  ;;  %2621 = vmatpush3.bf16.msra.mxu1 %v2618_v37  ;;  %v2305_v1 = vld [vmem:[%s3465_s2 + $0x90] sm:$0xff]  ;;  %v2306_v2 = vld [vmem:[%s3465_s2 + $0x98] sm:$0xff]  ;;  %v2307_v3 = vld [vmem:[%s3465_s2 + $0xa0] sm:$0xff] }
  0x45   : > { %v2308_v4 = vld [vmem:[%s3465_s2 + $0xa8] sm:$0xff]  ;;  %v2325_v5 = vld [vmem:[%s3465_s2 + $0xc0] sm:$0xff]  ;;  %v2327_v7 = vld [vmem:[%s3465_s2 + $0xd0] sm:$0xff] }
  0x46   : > { %281 = vperm.xlu0 %2822, %v255_v43   ;;  %286 = vperm.xlu1 %2823, %v256_v46   ;;  %v2326_v6 = vld [vmem:[%s3465_s2 + $0xc8] sm:$0xff]  ;;  %v2328_v8 = vld [vmem:[%s3465_s2 + $0xd8] sm:$0xff]  ;;  %v2341_v9 = vld [vmem:[%s3465_s2 + $0x100] sm:$0xff] }
  0x47   : > { %2249 = vmatmul.mubr.msk.f32.vlgmr.msra.gmra.mrb[0].mxu0 %vm299_vm0, %v243_v33  ;;  %2469 = vmatmul.mubr.msk.f32.vlgmr.msra.gmra.mrb[0].mxu1 %vm299_vm0, %v244_v44  ;;  %v2342_v10 = vld [vmem:[%s3465_s2 + $0x108] sm:$0xff]  ;;  %v2343_v11 = vld [vmem:[%s3465_s2 + $0x110] sm:$0xff]  ;;  %v2344_v12 = vld [vmem:[%s3465_s2 + $0x118] sm:$0xff] }
  0x48   : > { %394 = vmatprep.mubr.f32.mxu0 %v2915_v0  ;;  %2471 = vmatprep.mubr.msk.f32.mxu1 %vm299_vm0, %v245_v45  ;;  %v2355_v13 = vld [vmem:[%s3465_s2 + $0x140] sm:$0xff]  ;;  %v2356_v14 = vld [vmem:[%s3465_s2 + $0x148] sm:$0xff] }
  0x49   : > { %v2363_v15 = vld [vmem:[%s3465_s2 + $0x180] sm:$0xff]  ;;  %v2364_v16 = vld [vmem:[%s3465_s2 + $0x188] sm:$0xff] }
  0x4a   : > { %291 = vperm.xlu0 %2822, %v257_v47   ;;  %296 = vperm.xlu1 %2823, %v258_v50   ;;  %v2370_v17 = vld [vmem:[%s3465_s2 + $0x1c0] sm:$0xff] }
  0x4b   : > { %2250 = vmatmul.mubr.msk.f32.gmra.mrb[2].mxu0 %vm299_vm0, %v244_v44  ;;  %2472 = vmatmul.mubr.msk.f32.gmra.mrb[2].mxu1 %vm299_vm0, %v246_v48  ;;  %v3217_v18 = vld [vmem:[%s3464_s1 + $0x40] sm:$0xff] }
  0x4c   : > { %400 = vmatprep.mubr.f32.mxu0 %v2915_v0  ;;  %2474 = vmatprep.mubr.msk.f32.mxu1 %vm299_vm0, %v247_v49 }
  0x4e   : > { %586 = vperm.xlu0 %2822, %v2273_v51   ;;  %591 = vperm.xlu1 %2823, %v2274_v54  }
  0x4f   : > { %2251 = vmatmul.mubr.msk.f32.gmra.mrb[4].mxu0 %vm299_vm0, %v245_v45  ;;  %2475 = vmatmul.mubr.msk.f32.gmra.mrb[4].mxu1 %vm299_vm0, %v248_v52 }
  0x50   : > { %406 = vmatprep.mubr.f32.mxu0 %v2915_v0  ;;  %2477 = vmatprep.mubr.msk.f32.mxu1 %vm299_vm0, %v249_v53 }
  0x52   : > { %596 = vperm.xlu0 %2822, %v2275_v55   ;;  %601 = vperm.xlu1 %2823, %v2276_v57  }
  0x53   : > { %2252 = vmatmul.mubr.msk.f32.gmra.mrb[6].mxu0 %vm299_vm0, %v246_v48  ;;  %2478 = vmatmul.mubr.msk.f32.gmra.mrb[6].mxu1 %vm299_vm0, %v250_v56 }
  0x54   : > { %412 = vmatprep.mubr.f32.mxu0 %v2915_v0  ;;  %712 = vmatprep.mubr.f32.mxu1 %v2915_v0 }
  0x56   : > { %606 = vperm.xlu0 %2822, %v2277_v58   ;;  %611 = vperm.xlu1 %2823, %v2278_v59  }
  0x57   : > { %2253 = vmatmul.mubr.msk.f32.gmra.mrb[8].mxu0 %vm299_vm0, %v247_v49 }
  0x58   : > { %418 = vmatprep.mubr.f32.mxu0 %v2915_v0 }
  0x5a   : > { %616 = vperm.xlu0 %2822, %v2279_v60   ;;  %621 = vperm.xlu1 %2823, %v2280_v61  }
  0x5b   : > { %2254 = vmatmul.mubr.msk.f32.gmra.mrb[10].mxu0 %vm299_vm0, %v248_v52 }
  0x5c   : > { %424 = vmatprep.mubr.f32.mxu0 %v2915_v0 }
  0x5e   : > { %906 = vperm.xlu0 %2822, %v2303_v62   ;;  %911 = vperm.xlu1 %2823, %v2304_v63  }
  0x5f   : > { %2255 = vmatmul.mubr.msk.f32.gmra.mrb[12].mxu0 %vm299_vm0, %v249_v53 }
  0x60   : > { %430 = vmatprep.mubr.f32.mxu0 %v2915_v0 }
  0x62   : > { %916 = vperm.xlu0 %2822, %v2305_v1   ;;  %921 = vperm.xlu1 %2823, %v2306_v2  }
  0x63   : > { %2256 = vmatmul.mubr.msk.f32.gmra.mrb[14].mxu0 %vm299_vm0, %v250_v56 }
  0x64   : > { %2496 = vmatprep.mubr.msk.f32.mxu0 %vm299_vm0, %v3217_v18 }
  0x66   : > { %926 = vperm.xlu0 %2822, %v2307_v3   ;;  %931 = vperm.xlu1 %2823, %v2308_v4  }
  0x6a   : > { %1178 = vperm.xlu0 %2822, %v2325_v5   ;;  %1183 = vperm.xlu1 %2823, %v2326_v6  }
  0x6e   : > { %1188 = vperm.xlu0 %2822, %v2327_v7   ;;  %1193 = vperm.xlu1 %2823, %v2328_v8  }
  0x72   : > { %1407 = vperm.xlu0 %2822, %v2341_v9   ;;  %1412 = vperm.xlu1 %2823, %v2342_v10  }
  0x76   : > { %1417 = vperm.xlu0 %2822, %v2343_v11   ;;  %1422 = vperm.xlu1 %2823, %v2344_v12  }
  0x7a   : > { %1632 = vperm.xlu0 %2822, %v2355_v13   ;;  %1637 = vperm.xlu1 %2823, %v2356_v14  }
  0x7e   : > { %1812 = vperm.xlu0 %2822, %v2363_v15   ;;  %1817 = vperm.xlu1 %2823, %v2364_v16  }
  0x82   : > { %1991 = vperm.xlu0 %2822, %v2370_v17  }
  0xbd   : > { %v262_v19 = vpop.permute.xlu0 %261  ;;  %v272_v20 = vpop.permute.xlu1 %271 }
  0xc1   : > { %v267_v21 = vpop.permute.xlu0 %266  ;;  %v277_v22 = vpop.permute.xlu1 %276 }
  0xc5   : > { %v3221_v37 = vpop.permute.xlu1 %286  ;;  %v282_v45 = vpop.permute.xlu0 %281 }
  0xc9   : > { %v3224_v60 = vpop.permute.xlu1 %296  ;;  %v292_v5 = vpop.permute.xlu0 %291 }
 0x11a   : > { %v390_v23 = vpop.f32.mrb[0].mxu0  ;;  %v2470_v24 = vpop.f32.mrb[0].mxu1 }
 0x11b   : > { %v392_v25 = vpop.f32.mrb[1].mxu0  ;;  %v509_v26 = vadd.f32 %v2470_v24, %v267_v21  ;;  %v503_v27 = vpop.f32.mrb[1].mxu1  ;;  %v391_v28 = vadd.f32 %v390_v23, %v262_v19 }
 0x11c   : > { %v504_v29 = vadd.f32 %v503_v27, %v262_v19  ;;  %v393_v31 = vadd.f32 %v392_v25, %v262_v19 }
 0x11d   : > { %v547_v30 = vmax.f32 %v509_v26, 0.0  ;;  %v542_v41 = vmax.f32 %v391_v28, 0.0 }
 0x11e   : > { %v396_v32 = vpop.f32.mrb[2].mxu0  ;;  %v544_v33 = vmax.f32 %v504_v29, 0.0  ;;  %v2473_v35 = vpop.f32.mrb[2].mxu1  ;;  %v543_v46 = vmax.f32 %v393_v31, 0.0  ;;  %v2266_v29 = vld [vmem:[%s3464_s1 + $0x48] sm:$0xff] }
 0x11f   : > { %v397_v34 = vadd.f32 %v396_v32, %v267_v21  ;;  %v398_v36 = vpop.f32.mrb[3].mxu0  ;;  %v519_v38 = vadd.f32 %v2473_v35, %v277_v22  ;;  %v513_v40 = vpop.f32.mrb[3].mxu1  ;;  %v2267_v32 = vld [vmem:[%s3464_s1 + $0x50] sm:$0xff] }
 0x120   : > { %v399_v39 = vadd.f32 %v398_v36, %v267_v21  ;;  %v2638_v42 = vpack.c.bf16 %v547_v30, %v544_v33  ;;  %v514_v44 = vadd.f32 %v513_v40, %v272_v20 }
 0x121   : > { %v545_v43 = vmax.f32 %v397_v34, 0.0  ;;  %v553_v47 = vmax.f32 %v519_v38, 0.0 }
 0x122   : > { %v546_v48 = vmax.f32 %v399_v39, 0.0  ;;  %v402_v49 = vpop.f32.mrb[4].mxu0  ;;  %v550_v51 = vmax.f32 %v514_v44, 0.0  ;;  %v2476_v52 = vpop.f32.mrb[4].mxu1  ;;  %2639 = vmatprep.subr.bf16.mxu0 %v2638_v42 }
 0x123   : > { %v2624_v50 = vpack.c.bf16 %v545_v43, %v542_v41  ;;  %v404_v53 = vpop.f32.mrb[5].mxu0  ;;  %v529_v55 = vadd.f32 %v2476_v52, %v3221_v37  ;;  %v523_v56 = vpop.f32.mrb[5].mxu1  ;;  %2641 = vmatpush3.bf16.msra.mxu0 %v2638_v42  ;;  %v403_v58 = vadd.f32 %v402_v49, %v272_v20  ;;  %v2269_v41 = vld [vmem:[%s3464_s1 + $0x60] sm:$0xff] }
 0x124   : > { %v2622_v54 = vpack.c.bf16 %v546_v48, %v543_v46  ;;  %v2642_v57 = vpack.c.bf16 %v553_v47, %v550_v51  ;;  %v524_v59 = vadd.f32 %v523_v56, %v282_v45  ;;  %v405_v62 = vadd.f32 %v404_v53, %v272_v20  ;;  %v2270_v47 = vld [vmem:[%s3464_s1 + $0x68] sm:$0xff]  ;;  %v592_v56 = vpop.permute.xlu1 %591 }
 0x125   : > { %v559_v61 = vmax.f32 %v529_v55, 0.0  ;;  %v548_v9 = vmax.f32 %v403_v58, 0.0  ;;  %v2272_v55 = vld [vmem:[%s3464_s1 + $0x78] sm:$0xff] }
 0x126   : > { %v408_v63 = vpop.f32.mrb[6].mxu0  ;;  %2623 = vmatprep.subr.bf16.mxu1 %v2622_v54  ;;  %v556_v1 = vmax.f32 %v524_v59, 0.0  ;;  %v2479_v3 = vpop.f32.mrb[6].mxu1  ;;  %2643 = vmatprep.subr.bf16.mxu0 %v2642_v57  ;;  %v549_v13 = vmax.f32 %v405_v62, 0.0 }
 0x127   : > { %v409_v2 = vadd.f32 %v408_v63, %v277_v22  ;;  %v410_v4 = vpop.f32.mrb[7].mxu0  ;;  %2625 = vmatpush1.bf16.msra.mxu1 %v2624_v50  ;;  %v539_v6 = vadd.f32 %v2479_v3, %v3224_v60  ;;  %v533_v8 = vpop.f32.mrb[7].mxu1  ;;  %2645 = vmatpush3.bf16.msra.mxu0 %v2642_v57  ;;  %v2271_v50 = vld [vmem:[%s3464_s1 + $0x70] sm:$0xff] }
 0x128   : > { %v411_v7 = vadd.f32 %v410_v4, %v277_v22  ;;  %v2646_v10 = vpack.c.bf16 %v559_v61, %v556_v1  ;;  %v534_v12 = vadd.f32 %v533_v8, %v292_v5  ;;  %v587_v57 = vpop.permute.xlu0 %586  ;;  %v3283_v58 = vpop.permute.xlu1 %601 }
 0x129   : > { %v551_v11 = vmax.f32 %v409_v2, 0.0  ;;  %v565_v14 = vmax.f32 %v539_v6, 0.0 }
 0x12a   : > { %v552_v15 = vmax.f32 %v411_v7, 0.0  ;;  %v414_v16 = vpop.f32.mrb[8].mxu0  ;;  %v562_v19 = vmax.f32 %v534_v12, 0.0  ;;  %2647 = vmatprep.subr.bf16.mxu0 %v2646_v10 }
 0x12b   : > { %v2628_v17 = vpack.c.bf16 %v551_v11, %v548_v9  ;;  %v416_v20 = vpop.f32.mrb[9].mxu0  ;;  %2649 = vmatpush3.bf16.msra.mxu0 %v2646_v10  ;;  %v415_v24 = vadd.f32 %v414_v16, %v282_v45 }
 0x12c   : > { %v2626_v21 = vpack.c.bf16 %v552_v15, %v549_v13  ;;  %v2650_v23 = vpack.c.bf16 %v565_v14, %v562_v19  ;;  %v417_v25 = vadd.f32 %v416_v20, %v282_v45  ;;  %v3288_v6 = vpop.permute.xlu1 %611 }
 0x12d   : > { %v554_v30 = vmax.f32 %v415_v24, 0.0 }
 0x12e   : > { %v420_v22 = vpop.f32.mrb[10].mxu0  ;;  %2627 = vmatprep.subr.bf16.mxu1 %v2626_v21  ;;  %2651 = vmatprep.subr.bf16.mxu0 %v2650_v23  ;;  %v555_v33 = vmax.f32 %v417_v25, 0.0 }
 0x12f   : > { %v421_v26 = vadd.f32 %v420_v22, %v3221_v37  ;;  %v422_v27 = vpop.f32.mrb[11].mxu0  ;;  %2629 = vmatpush1.bf16.msra.mxu1 %v2628_v17  ;;  %2653 = vmatpush3.bf16.msra.mxu0 %v2650_v23 }
 0x130   : > { %v423_v28 = vadd.f32 %v422_v27, %v3221_v37  ;;  %v2268_v37 = vld [vmem:[%s3464_s1 + $0x58] sm:$0xff]  ;;  %v3295_v19 = vpop.permute.xlu1 %621 }
 0x131   : > { %v557_v31 = vmax.f32 %v421_v26, 0.0 }
 0x132   : > { %v558_v34 = vmax.f32 %v423_v28, 0.0  ;;  %v426_v35 = vpop.f32.mrb[12].mxu0  ;;  %2497 = vmatmul.mubr.msk.f32.vlgmr.msra.gmra.mrb[16].mxu0 %vm299_vm0, %v2266_v29 }
 0x133   : > { %v2632_v36 = vpack.c.bf16 %v557_v31, %v554_v30  ;;  %v428_v38 = vpop.f32.mrb[13].mxu0  ;;  %2499 = vmatprep.mubr.msk.f32.mxu0 %vm299_vm0, %v2267_v32  ;;  %v427_v40 = vadd.f32 %v426_v35, %v292_v5 }
 0x134   : > { %v2630_v39 = vpack.c.bf16 %v558_v34, %v555_v33  ;;  %v429_v42 = vadd.f32 %v428_v38, %v292_v5 }
 0x135   : > { %v560_v48 = vmax.f32 %v427_v40, 0.0 }
 0x136   : > { %v432_v43 = vpop.f32.mrb[14].mxu0  ;;  %2631 = vmatprep.subr.bf16.mxu1 %v2630_v39  ;;  %2500 = vmatmul.mubr.msk.f32.gmra.mrb[18].mxu0 %vm299_vm0, %v2268_v37  ;;  %v561_v51 = vmax.f32 %v429_v42, 0.0  ;;  %v3304_v39 = vld [vmem:[%s3464_s1 + $0x88] sm:$0xff] }
 0x137   : > { %v433_v44 = vadd.f32 %v432_v43, %v3224_v60  ;;  %v434_v45 = vpop.f32.mrb[15].mxu0  ;;  %2633 = vmatpush1.bf16.msra.mxu1 %v2632_v36  ;;  %2502 = vmatprep.mubr.msk.f32.mxu0 %vm299_vm0, %v2269_v41 }
 0x138   : > { %v435_v46 = vadd.f32 %v434_v45, %v3224_v60  ;;  %v3285_v60 = vpop.permute.xlu0 %596 }
 0x139   : > { %v563_v49 = vmax.f32 %v433_v44, 0.0 }
 0x13a   : > { %v564_v52 = vmax.f32 %v435_v46, 0.0  ;;  %2503 = vmatmul.mubr.msk.f32.gmra.mrb[20].mxu0 %vm299_vm0, %v2270_v47 }
 0x13b   : > { %v2636_v53 = vpack.c.bf16 %v563_v49, %v560_v48  ;;  %2505 = vmatprep.mubr.msk.f32.mxu0 %vm299_vm0, %v2271_v50  ;;  %v2300_v48 = vld [vmem:[%s3464_s1 + $0x98] sm:$0xff] }
 0x13c   : > { %v2634_v54 = vpack.c.bf16 %v564_v52, %v561_v51  ;;  %v3291_v9 = vpop.permute.xlu0 %606 }
 0x13e   : > { %2635 = vmatprep.subr.bf16.mxu1 %v2634_v54  ;;  %2506 = vmatmul.mubr.msk.f32.gmra.mrb[22].mxu0 %vm299_vm0, %v2272_v55 }
 0x13f   : > { %2637 = vmatpush1.bf16.msra.mxu1 %v2636_v53  ;;  %1016 = vmatprep.mubr.f32.mxu0 %v2915_v0 }
 0x140   : > { %v3297_v23 = vpop.permute.xlu0 %616 }
 0x142   : > { %2281 = vmatmul.mubr.msk.f32.vlgmr.msra.gmra.mrb[8].mxu1 %vm299_vm0, %v3217_v18  ;;  %v3279_v18 = vld [vmem:[%s3464_s1 + $0x80] sm:$0xff] }
 0x143   : > { %718 = vmatprep.mubr.f32.mxu1 %v2915_v0 }
 0x146   : > { %2282 = vmatmul.mubr.msk.f32.gmra.mrb[10].mxu1 %vm299_vm0, %v2266_v29 }
 0x147   : > { %724 = vmatprep.mubr.f32.mxu1 %v2915_v0 }
 0x14a   : > { %2283 = vmatmul.mubr.msk.f32.gmra.mrb[12].mxu1 %vm299_vm0, %v2267_v32 }
 0x14b   : > { %730 = vmatprep.mubr.f32.mxu1 %v2915_v0 }
 0x14e   : > { %2284 = vmatmul.mubr.msk.f32.gmra.mrb[14].mxu1 %vm299_vm0, %v2268_v37 }
 0x14f   : > { %736 = vmatprep.mubr.f32.mxu1 %v2915_v0 }
 0x152   : > { %2285 = vmatmul.mubr.msk.f32.gmra.mrb[16].mxu1 %vm299_vm0, %v2269_v41  ;;  %v3309_v41 = vld [vmem:[%s3464_s1 + $0x90] sm:$0xff] }
 0x153   : > { %742 = vmatprep.mubr.f32.mxu1 %v2915_v0 }
 0x156   : > { %2286 = vmatmul.mubr.msk.f32.gmra.mrb[18].mxu1 %vm299_vm0, %v2270_v47 }
 0x157   : > { %748 = vmatprep.mubr.f32.mxu1 %v2915_v0 }
 0x15a   : > { %2287 = vmatmul.mubr.msk.f32.gmra.mrb[20].mxu1 %vm299_vm0, %v2271_v50  ;;  %v2301_v50 = vld [vmem:[%s3464_s1 + $0xa0] sm:$0xff] }
 0x15b   : > { %754 = vmatprep.mubr.f32.mxu1 %v2915_v0 }
 0x15e   : > { %2288 = vmatmul.mubr.msk.f32.gmra.mrb[22].mxu1 %vm299_vm0, %v2272_v55 }
 0x15f   : > { %2524 = vmatprep.mubr.msk.f32.mxu1 %vm299_vm0, %v3279_v18 }
 0x205   : > { %v2498_v59 = vpop.f32.mrb[16].mxu0 }
 0x206   : > { %v833_v61 = vadd.f32 %v2498_v59, %v592_v56  ;;  %v827_v62 = vpop.f32.mrb[17].mxu0 }
 0x207   : > { %v828_v63 = vadd.f32 %v827_v62, %v587_v57 }
 0x208   : > { %v871_v1 = vmax.f32 %v833_v61, 0.0 }
 0x209   : > { %v868_v2 = vmax.f32 %v828_v63, 0.0  ;;  %v2501_v3 = vpop.f32.mrb[18].mxu0 }
 0x20a   : > { %v843_v4 = vadd.f32 %v2501_v3, %v3283_v58  ;;  %v837_v5 = vpop.f32.mrb[19].mxu0 }
 0x20b   : > { %v2670_v7 = vpack.c.bf16 %v871_v1, %v868_v2  ;;  %v838_v8 = vadd.f32 %v837_v5, %v3285_v60 }
 0x20c   : > { %v877_v10 = vmax.f32 %v843_v4, 0.0 }
 0x20d   : > { %v874_v11 = vmax.f32 %v838_v8, 0.0  ;;  %v2504_v12 = vpop.f32.mrb[20].mxu0  ;;  %2671 = vmatprep.subr.bf16.mxu1 %v2670_v7 }
 0x20e   : > { %v853_v13 = vadd.f32 %v2504_v12, %v3288_v6  ;;  %v847_v14 = vpop.f32.mrb[21].mxu0  ;;  %2673 = vmatpush3.bf16.msra.mxu1 %v2670_v7 }
 0x20f   : > { %v2674_v15 = vpack.c.bf16 %v877_v10, %v874_v11  ;;  %v848_v16 = vadd.f32 %v847_v14, %v3291_v9 }
 0x210   : > { %v883_v17 = vmax.f32 %v853_v13, 0.0 }
 0x211   : > { %v880_v20 = vmax.f32 %v848_v16, 0.0  ;;  %v2507_v21 = vpop.f32.mrb[22].mxu0  ;;  %2675 = vmatprep.subr.bf16.mxu1 %v2674_v15 }
 0x212   : > { %v863_v24 = vadd.f32 %v2507_v21, %v3295_v19  ;;  %v857_v25 = vpop.f32.mrb[23].mxu0  ;;  %2677 = vmatpush3.bf16.msra.mxu1 %v2674_v15 }
 0x213   : > { %v2678_v22 = vpack.c.bf16 %v883_v17, %v880_v20  ;;  %v858_v26 = vadd.f32 %v857_v25, %v3297_v23 }
 0x214   : > { %v889_v27 = vmax.f32 %v863_v24, 0.0 }
 0x215   : > { %v714_v28 = vpop.f32.mrb[8].mxu1  ;;  %v886_v29 = vmax.f32 %v858_v26, 0.0  ;;  %2679 = vmatprep.subr.bf16.mxu1 %v2678_v22 }
 0x216   : > { %v716_v30 = vpop.f32.mrb[9].mxu1  ;;  %2681 = vmatpush3.bf16.msra.mxu1 %v2678_v22  ;;  %v715_v32 = vadd.f32 %v714_v28, %v587_v57 }
 0x217   : > { %v2682_v31 = vpack.c.bf16 %v889_v27, %v886_v29  ;;  %v717_v33 = vadd.f32 %v716_v30, %v587_v57 }
 0x218   : > { %v866_v37 = vmax.f32 %v715_v32, 0.0 }
 0x219   : > { %v720_v34 = vpop.f32.mrb[10].mxu1  ;;  %2683 = vmatprep.subr.bf16.mxu1 %v2682_v31  ;;  %v867_v42 = vmax.f32 %v717_v33, 0.0 }
 0x21a   : > { %v721_v35 = vadd.f32 %v720_v34, %v592_v56  ;;  %v722_v36 = vpop.f32.mrb[11].mxu1  ;;  %2685 = vmatpush3.bf16.msra.mxu1 %v2682_v31 }
 0x21b   : > { %v723_v38 = vadd.f32 %v722_v36, %v592_v56  ;;  %v2302_v56 = vld [vmem:[%s3464_s1 + $0xa8] sm:$0xff] }
 0x21c   : > { %v869_v40 = vmax.f32 %v721_v35, 0.0 }
 0x21d   : > { %v870_v43 = vmax.f32 %v723_v38, 0.0  ;;  %v726_v44 = vpop.f32.mrb[12].mxu1  ;;  %2525 = vmatmul.mubr.msk.f32.vlgmr.msra.gmra.mrb[24].mxu1 %vm299_vm0, %v3304_v39 }
 0x21e   : > { %v2656_v45 = vpack.c.bf16 %v869_v40, %v866_v37  ;;  %v728_v46 = vpop.f32.mrb[13].mxu1  ;;  %2527 = vmatprep.mubr.msk.f32.mxu1 %vm299_vm0, %v3309_v41  ;;  %v727_v49 = vadd.f32 %v726_v44, %v3285_v60 }
 0x21f   : > { %v2654_v47 = vpack.c.bf16 %v870_v43, %v867_v42  ;;  %v729_v51 = vadd.f32 %v728_v46, %v3285_v60 }
 0x220   : > { %v872_v57 = vmax.f32 %v727_v49, 0.0 }
 0x221   : > { %v732_v52 = vpop.f32.mrb[14].mxu1  ;;  %2655 = vmatprep.subr.bf16.mxu0 %v2654_v47  ;;  %2528 = vmatmul.mubr.msk.f32.gmra.mrb[26].mxu1 %vm299_vm0, %v2300_v48  ;;  %v873_v61 = vmax.f32 %v729_v51, 0.0 }
 0x222   : > { %v733_v53 = vadd.f32 %v732_v52, %v3283_v58  ;;  %v734_v54 = vpop.f32.mrb[15].mxu1  ;;  %2657 = vmatpush1.bf16.msra.mxu0 %v2656_v45  ;;  %2530 = vmatprep.mubr.msk.f32.mxu1 %vm299_vm0, %v2301_v50 }
 0x223   : > { %v735_v55 = vadd.f32 %v734_v54, %v3283_v58 }
 0x224   : > { %v875_v59 = vmax.f32 %v733_v53, 0.0 }
 0x225   : > { %v876_v60 = vmax.f32 %v735_v55, 0.0  ;;  %v738_v62 = vpop.f32.mrb[16].mxu1  ;;  %2531 = vmatmul.mubr.msk.f32.gmra.mrb[28].mxu1 %vm299_vm0, %v2302_v56 }
 0x226   : > { %v2660_v63 = vpack.c.bf16 %v875_v59, %v872_v57  ;;  %v740_v1 = vpop.f32.mrb[17].mxu1  ;;  %1273 = vmatprep.mubr.f32.mxu1 %v2915_v0  ;;  %v739_v58 = vadd.f32 %v738_v62, %v3291_v9  ;;  %v2323_v57 = vld [vmem:[%s3464_s1 + $0xd0] sm:$0xff]  ;;  %v2324_v59 = vld [vmem:[%s3464_s1 + $0xd8] sm:$0xff] }
 0x227   : > { %v2658_v2 = vpack.c.bf16 %v876_v60, %v873_v61  ;;  %v741_v3 = vadd.f32 %v740_v1, %v3291_v9 }
 0x228   : > { %v878_v10 = vmax.f32 %v739_v58, 0.0 }
 0x229   : > { %v744_v4 = vpop.f32.mrb[18].mxu1  ;;  %2659 = vmatprep.subr.bf16.mxu0 %v2658_v2  ;;  %v879_v12 = vmax.f32 %v741_v3, 0.0 }
 0x22a   : > { %v745_v5 = vadd.f32 %v744_v4, %v3288_v6  ;;  %v746_v7 = vpop.f32.mrb[19].mxu1  ;;  %2661 = vmatpush1.bf16.msra.mxu0 %v2660_v63 }
 0x22b   : > { %v747_v8 = vadd.f32 %v746_v7, %v3288_v6 }
 0x22c   : > { %v881_v11 = vmax.f32 %v745_v5, 0.0 }
 0x22d   : > { %v882_v13 = vmax.f32 %v747_v8, 0.0  ;;  %v750_v14 = vpop.f32.mrb[20].mxu1 }
 0x22e   : > { %v2664_v15 = vpack.c.bf16 %v881_v11, %v878_v10  ;;  %v752_v16 = vpop.f32.mrb[21].mxu1  ;;  %v751_v20 = vadd.f32 %v750_v14, %v3297_v23 }
 0x22f   : > { %v2662_v17 = vpack.c.bf16 %v882_v13, %v879_v12  ;;  %v753_v9 = vadd.f32 %v752_v16, %v3297_v23  ;;  %v907_v23 = vpop.permute.xlu0 %906 }
 0x230   : > { %v884_v22 = vmax.f32 %v751_v20, 0.0 }
 0x231   : > { %v756_v21 = vpop.f32.mrb[22].mxu1  ;;  %2663 = vmatprep.subr.bf16.mxu0 %v2662_v17  ;;  %v885_v27 = vmax.f32 %v753_v9, 0.0 }
 0x232   : > { %v757_v24 = vadd.f32 %v756_v21, %v3295_v19  ;;  %v758_v25 = vpop.f32.mrb[23].mxu1  ;;  %2665 = vmatpush1.bf16.msra.mxu0 %v2664_v15 }
 0x233   : > { %v759_v6 = vadd.f32 %v758_v25, %v3295_v19  ;;  %v912_v19 = vpop.permute.xlu1 %911  ;;  %v917_v36 = vpop.permute.xlu0 %916 }
 0x234   : > { %v887_v26 = vmax.f32 %v757_v24, 0.0 }
 0x235   : > { %v888_v28 = vmax.f32 %v759_v6, 0.0 }
 0x236   : > { %v2668_v29 = vpack.c.bf16 %v887_v26, %v884_v22 }
 0x237   : > { %v2666_v30 = vpack.c.bf16 %v888_v28, %v885_v27  ;;  %v922_v34 = vpop.permute.xlu1 %921 }
 0x239   : > { %2667 = vmatprep.subr.bf16.mxu0 %v2666_v30 }
 0x23a   : > { %2669 = vmatpush1.bf16.msra.mxu0 %v2668_v29 }
 0x23b   : > { %v932_v45 = vpop.permute.xlu1 %931 }
 0x23d   : > { %2309 = vmatmul.mubr.msk.f32.vlgmr.msra.gmra.mrb[24].mxu0 %vm299_vm0, %v3279_v18  ;;  %v3357_v18 = vld [vmem:[%s3464_s1 + $0xc0] sm:$0xff] }
 0x23e   : > { %1022 = vmatprep.mubr.f32.mxu0 %v2915_v0 }
 0x241   : > { %2310 = vmatmul.mubr.msk.f32.gmra.mrb[26].mxu0 %vm299_vm0, %v3304_v39 }
 0x242   : > { %1028 = vmatprep.mubr.f32.mxu0 %v2915_v0 }
 0x245   : > { %2311 = vmatmul.mubr.msk.f32.gmra.mrb[28].mxu0 %vm299_vm0, %v3309_v41 }
 0x246   : > { %1034 = vmatprep.mubr.f32.mxu0 %v2915_v0 }
 0x249   : > { %2312 = vmatmul.mubr.msk.f32.gmra.mrb[30].mxu0 %vm299_vm0, %v2300_v48  ;;  %v927_v48 = vpop.permute.xlu0 %926 }
 0x24a   : > { %1040 = vmatprep.mubr.f32.mxu0 %v2915_v0 }
 0x24d   : > { %2313 = vmatmul.mubr.msk.f32.gmra.mrb[32].mxu0 %vm299_vm0, %v2301_v50 }
 0x24e   : > { %1046 = vmatprep.mubr.f32.mxu0 %v2915_v0 }
 0x251   : > { %2314 = vmatmul.mubr.msk.f32.gmra.mrb[34].mxu0 %vm299_vm0, %v2302_v56  ;;  %v2322_v56 = vld [vmem:[%s3464_s1 + $0xc8] sm:$0xff] }
 0x252   : > { %2545 = vmatprep.mubr.msk.f32.mxu0 %vm1196_vm1, %v3357_v18 }
 0x2f0   : > { %v2526_v31 = vpop.f32.mrb[24].mxu1 }
 0x2f1   : > { %v1125_v32 = vadd.f32 %v2526_v31, %v912_v19  ;;  %v1119_v33 = vpop.f32.mrb[25].mxu1 }
 0x2f2   : > { %v1120_v35 = vadd.f32 %v1119_v33, %v907_v23 }
 0x2f3   : > { %v1153_v38 = vmax.f32 %v1125_v32, 0.0 }
 0x2f4   : > { %v1150_v39 = vmax.f32 %v1120_v35, 0.0  ;;  %v2529_v37 = vpop.f32.mrb[26].mxu1 }
 0x2f5   : > { %v1135_v40 = vadd.f32 %v2529_v37, %v922_v34  ;;  %v1129_v41 = vpop.f32.mrb[27].mxu1  ;;  %v3385_v37 = vld [vmem:[%s3464_s1 + $0x100] sm:$0xff] }
 0x2f6   : > { %v2698_v42 = vpack.c.bf16 %v1153_v38, %v1150_v39  ;;  %v1130_v43 = vadd.f32 %v1129_v41, %v917_v36 }
 0x2f7   : > { %v1159_v44 = vmax.f32 %v1135_v40, 0.0  ;;  %v1179_v40 = vpop.permute.xlu0 %1178 }
 0x2f8   : > { %v1156_v46 = vmax.f32 %v1130_v43, 0.0  ;;  %v2532_v47 = vpop.f32.mrb[28].mxu1  ;;  %2699 = vmatprep.subr.bf16.mxu0 %v2698_v42 }
 0x2f9   : > { %v1145_v49 = vadd.f32 %v2532_v47, %v932_v45  ;;  %v1139_v50 = vpop.f32.mrb[29].mxu1  ;;  %2701 = vmatpush3.bf16.msra.mxu0 %v2698_v42 }
 0x2fa   : > { %v2702_v51 = vpack.c.bf16 %v1159_v44, %v1156_v46  ;;  %v1140_v52 = vadd.f32 %v1139_v50, %v927_v48 }
 0x2fb   : > { %v1165_v53 = vmax.f32 %v1145_v49, 0.0  ;;  %v1189_v49 = vpop.permute.xlu0 %1188 }
 0x2fc   : > { %v1162_v54 = vmax.f32 %v1140_v52, 0.0  ;;  %2703 = vmatprep.subr.bf16.mxu0 %v2702_v51 }
 0x2fd   : > { %2705 = vmatpush3.bf16.msra.mxu0 %v2702_v51 }
 0x2fe   : > { %v2706_v55 = vpack.c.bf16 %v1165_v53, %v1162_v54 }
 0x300   : > { %2707 = vmatprep.subr.bf16.mxu0 %v2706_v55 }
 0x301   : > { %2709 = vmatpush3.bf16.msra.mxu0 %v2706_v55 }
 0x304   : > { %2546 = vmatmul.mubr.msk.f32.vlgmr.msra.gmra.mrb[36].mxu0 %vm1196_vm1, %v2322_v56 }
 0x305   : > { %2548 = vmatprep.mubr.msk.f32.mxu0 %vm1196_vm1, %v2323_v57 }
 0x308   : > { %2549 = vmatmul.mubr.msk.f32.gmra.mrb[38].mxu0 %vm1196_vm1, %v2324_v59 }
 0x309   : > { %2559 = vmatprep.mubr.msk.f32.mxu0 %vm1425_vm2, %v3385_v37 }
 0x310   : > { %v1018_v61 = vpop.f32.mrb[24].mxu0 }
 0x311   : > { %v1020_v60 = vpop.f32.mrb[25].mxu0  ;;  %v1019_v62 = vadd.f32 %v1018_v61, %v907_v23  ;;  %v2340_v61 = vld [vmem:[%s3464_s1 + $0x118] sm:$0xff] }
 0x312   : > { %v1021_v63 = vadd.f32 %v1020_v60, %v907_v23 }
 0x313   : > { %v1148_v4 = vmax.f32 %v1019_v62, 0.0 }
 0x314   : > { %v1024_v1 = vpop.f32.mrb[26].mxu0  ;;  %v1149_v7 = vmax.f32 %v1021_v63, 0.0 }
 0x315   : > { %v1025_v2 = vadd.f32 %v1024_v1, %v912_v19  ;;  %v1026_v58 = vpop.f32.mrb[27].mxu0 }
 0x316   : > { %v1027_v3 = vadd.f32 %v1026_v58, %v912_v19 }
 0x317   : > { %v1151_v5 = vmax.f32 %v1025_v2, 0.0 }
 0x318   : > { %v1152_v8 = vmax.f32 %v1027_v3, 0.0  ;;  %v1030_v10 = vpop.f32.mrb[28].mxu0 }
 0x319   : > { %v2688_v11 = vpack.c.bf16 %v1151_v5, %v1148_v4  ;;  %v1032_v12 = vpop.f32.mrb[29].mxu0  ;;  %v1031_v14 = vadd.f32 %v1030_v10, %v917_v36 }
 0x31a   : > { %v2686_v13 = vpack.c.bf16 %v1152_v8, %v1149_v7  ;;  %v1033_v15 = vadd.f32 %v1032_v12, %v917_v36 }
 0x31b   : > { %v1154_v21 = vmax.f32 %v1031_v14, 0.0 }
 0x31c   : > { %v1036_v16 = vpop.f32.mrb[30].mxu0  ;;  %2687 = vmatprep.subr.bf16.mxu1 %v2686_v13  ;;  %v1155_v25 = vmax.f32 %v1033_v15, 0.0 }
 0x31d   : > { %v1037_v17 = vadd.f32 %v1036_v16, %v922_v34  ;;  %v1038_v20 = vpop.f32.mrb[31].mxu0  ;;  %2689 = vmatpush1.bf16.msra.mxu1 %v2688_v11 }
 0x31e   : > { %v1039_v9 = vadd.f32 %v1038_v20, %v922_v34 }
 0x31f   : > { %v1157_v24 = vmax.f32 %v1037_v17, 0.0 }
 0x320   : > { %v1158_v6 = vmax.f32 %v1039_v9, 0.0  ;;  %v1042_v22 = vpop.f32.mrb[32].mxu0 }
 0x321   : > { %v2692_v26 = vpack.c.bf16 %v1157_v24, %v1154_v21  ;;  %v1044_v27 = vpop.f32.mrb[33].mxu0  ;;  %v1043_v29 = vadd.f32 %v1042_v22, %v927_v48 }
 0x322   : > { %v2690_v28 = vpack.c.bf16 %v1158_v6, %v1155_v25  ;;  %v1045_v30 = vadd.f32 %v1044_v27, %v927_v48 }
 0x323   : > { %v1160_v33 = vmax.f32 %v1043_v29, 0.0 }
 0x324   : > { %v1048_v19 = vpop.f32.mrb[34].mxu0  ;;  %2691 = vmatprep.subr.bf16.mxu1 %v2690_v28  ;;  %v1161_v36 = vmax.f32 %v1045_v30, 0.0  ;;  %v2353_v28 = vld [vmem:[%s3464_s1 + $0x140] sm:$0xff]  ;;  %v1408_v30 = vpop.permute.xlu0 %1407 }
 0x325   : > { %v1049_v23 = vadd.f32 %v1048_v19, %v932_v45  ;;  %v1050_v31 = vpop.f32.mrb[35].mxu0  ;;  %2693 = vmatpush1.bf16.msra.mxu1 %v2692_v26 }
 0x326   : > { %v1051_v32 = vadd.f32 %v1050_v31, %v932_v45 }
 0x327   : > { %v1163_v35 = vmax.f32 %v1049_v23, 0.0 }
 0x328   : > { %v1164_v34 = vmax.f32 %v1051_v32, 0.0 }
 0x329   : > { %v2696_v38 = vpack.c.bf16 %v1163_v35, %v1160_v33 }
 0x32a   : > { %v2694_v39 = vpack.c.bf16 %v1164_v34, %v1161_v36 }
 0x32c   : > { %2695 = vmatprep.subr.bf16.mxu1 %v2694_v39 }
 0x32d   : > { %2697 = vmatpush1.bf16.msra.mxu1 %v2696_v38  ;;  %v1418_v38 = vpop.permute.xlu0 %1417 }
 0x330   : > { %2329 = vmatmul.mubr.msk.f32.vlgmr.msra.gmra.mrb[30].mxu1 %vm1196_vm1, %v3357_v18  ;;  %v1184_v18 = vpop.permute.xlu1 %1183 }
 0x331   : > { %1279 = vmatprep.mubr.f32.mxu1 %v2915_v0 }
 0x334   : > { %2330 = vmatmul.mubr.msk.f32.gmra.mrb[32].mxu1 %vm1196_vm1, %v2322_v56  ;;  %v1194_v46 = vpop.permute.xlu1 %1193 }
 0x335   : > { %1285 = vmatprep.mubr.f32.mxu1 %v2915_v0 }
 0x338   : > { %2331 = vmatmul.mubr.msk.f32.gmra.mrb[34].mxu1 %vm1196_vm1, %v2323_v57  ;;  %v2338_v57 = vld [vmem:[%s3464_s1 + $0x108] sm:$0xff]  ;;  %v1413_v29 = vpop.permute.xlu1 %1412 }
 0x339   : > { %1291 = vmatprep.mubr.f32.mxu1 %v2915_v0 }
 0x33c   : > { %2332 = vmatmul.mubr.msk.f32.gmra.mrb[36].mxu1 %vm1196_vm1, %v2324_v59  ;;  %v2339_v59 = vld [vmem:[%s3464_s1 + $0x110] sm:$0xff]  ;;  %v1423_v35 = vpop.permute.xlu1 %1422 }
 0x33d   : > { %1502 = vmatprep.mubr.f32.mxu1 %v2915_v0 }
 0x3d7   : > { %v2547_v41 = vpop.f32.mrb[36].mxu0 }
 0x3d8   : > { %v1370_v42 = vadd.f32 %v2547_v41, %v1184_v18  ;;  %v1364_v43 = vpop.f32.mrb[37].mxu0 }
 0x3d9   : > { %v1365_v44 = vadd.f32 %v1364_v43, %v1179_v40 }
 0x3da   : > { %v1388_v45 = vmax.f32 %v1370_v42, 0.0 }
 0x3db   : > { %v1385_v47 = vmax.f32 %v1365_v44, 0.0  ;;  %v2550_v48 = vpop.f32.mrb[38].mxu0  ;;  %v2354_v44 = vld [vmem:[%s3464_s1 + $0x148] sm:$0xff] }
 0x3dc   : > { %v1380_v50 = vadd.f32 %v2550_v48, %v1194_v46  ;;  %v1374_v51 = vpop.f32.mrb[39].mxu0 }
 0x3dd   : > { %v2718_v52 = vpack.c.bf16 %v1388_v45, %v1385_v47  ;;  %v1375_v53 = vadd.f32 %v1374_v51, %v1189_v49 }
 0x3de   : > { %v1394_v54 = vmax.f32 %v1380_v50, 0.0 }
 0x3df   : > { %v1391_v55 = vmax.f32 %v1375_v53, 0.0  ;;  %2719 = vmatprep.subr.bf16.mxu0 %v2718_v52 }
 0x3e0   : > { %2721 = vmatpush3.bf16.msra.mxu0 %v2718_v52 }
 0x3e1   : > { %v2722_v56 = vpack.c.bf16 %v1394_v54, %v1391_v55 }
 0x3e3   : > { %2723 = vmatprep.subr.bf16.mxu0 %v2722_v56 }
 0x3e4   : > { %2725 = vmatpush3.bf16.msra.mxu0 %v2722_v56 }
 0x3e7   : > { %2560 = vmatmul.mubr.msk.f32.vlgmr.msra.gmra.mrb[40].mxu0 %vm1425_vm2, %v2338_v57 }
 0x3e8   : > { %2562 = vmatprep.mubr.msk.f32.mxu0 %vm1425_vm2, %v2339_v59 }
 0x3eb   : > { %2563 = vmatmul.mubr.msk.f32.gmra.mrb[42].mxu0 %vm1425_vm2, %v2340_v61 }
 0x3ec   : > { %1710 = vmatprep.mubr.f32.mxu0 %v2915_v0 }
 0x403   : > { %v1275_v60 = vpop.f32.mrb[30].mxu1 }
 0x404   : > { %v1277_v62 = vpop.f32.mrb[31].mxu1  ;;  %v1276_v63 = vadd.f32 %v1275_v60, %v1179_v40 }
 0x405   : > { %v1278_v1 = vadd.f32 %v1277_v62, %v1179_v40 }
 0x406   : > { %v1383_v5 = vmax.f32 %v1276_v63, 0.0 }
 0x407   : > { %v1281_v2 = vpop.f32.mrb[32].mxu1  ;;  %v1384_v8 = vmax.f32 %v1278_v1, 0.0 }
 0x408   : > { %v1282_v58 = vadd.f32 %v1281_v2, %v1184_v18  ;;  %v1283_v3 = vpop.f32.mrb[33].mxu1 }
 0x409   : > { %v1284_v4 = vadd.f32 %v1283_v3, %v1184_v18 }
 0x40a   : > { %v1386_v7 = vmax.f32 %v1282_v58, 0.0 }
 0x40b   : > { %v1387_v10 = vmax.f32 %v1284_v4, 0.0  ;;  %v1287_v11 = vpop.f32.mrb[34].mxu1 }
 0x40c   : > { %v2712_v12 = vpack.c.bf16 %v1386_v7, %v1383_v5  ;;  %v1289_v13 = vpop.f32.mrb[35].mxu1  ;;  %v1288_v15 = vadd.f32 %v1287_v11, %v1189_v49 }
 0x40d   : > { %v2710_v14 = vpack.c.bf16 %v1387_v10, %v1384_v8  ;;  %v1290_v16 = vadd.f32 %v1289_v13, %v1189_v49  ;;  %v1638_v13 = vpop.permute.xlu1 %1637 }
 0x40e   : > { %v1389_v24 = vmax.f32 %v1288_v15, 0.0  ;;  %v1633_v15 = vpop.permute.xlu0 %1632 }
 0x40f   : > { %v1293_v17 = vpop.f32.mrb[36].mxu1  ;;  %2711 = vmatprep.subr.bf16.mxu1 %v2710_v14  ;;  %v1390_v6 = vmax.f32 %v1290_v16, 0.0 }
 0x410   : > { %v1294_v20 = vadd.f32 %v1293_v17, %v1194_v46  ;;  %v1295_v9 = vpop.f32.mrb[37].mxu1  ;;  %2713 = vmatpush1.bf16.msra.mxu1 %v2712_v12  ;;  %v2361_v12 = vld [vmem:[%s3464_s1 + $0x180] sm:$0xff] }
 0x411   : > { %v1296_v21 = vadd.f32 %v1295_v9, %v1194_v46 }
 0x412   : > { %v1392_v25 = vmax.f32 %v1294_v20, 0.0 }
 0x413   : > { %v1393_v22 = vmax.f32 %v1296_v21, 0.0 }
 0x414   : > { %v2716_v26 = vpack.c.bf16 %v1392_v25, %v1389_v24  ;;  %v2362_v25 = vld [vmem:[%s3464_s1 + $0x188] sm:$0xff] }
 0x415   : > { %v2714_v27 = vpack.c.bf16 %v1393_v22, %v1390_v6 }
 0x417   : > { %2715 = vmatprep.subr.bf16.mxu1 %v2714_v27 }
 0x418   : > { %2717 = vmatpush1.bf16.msra.mxu1 %v2716_v26 }
 0x41b   : > { %2345 = vmatmul.mubr.msk.f32.vlgmr.msra.gmra.mrb[38].mxu1 %vm1425_vm2, %v3385_v37 }
 0x41c   : > { %1508 = vmatprep.mubr.f32.mxu1 %v2915_v0 }
 0x41f   : > { %2346 = vmatmul.mubr.msk.f32.gmra.mrb[40].mxu1 %vm1425_vm2, %v2338_v57 }
 0x420   : > { %1514 = vmatprep.mubr.f32.mxu1 %v2915_v0 }
 0x423   : > { %2347 = vmatmul.mubr.msk.f32.gmra.mrb[42].mxu1 %vm1425_vm2, %v2339_v59 }
 0x424   : > { %1520 = vmatprep.mubr.f32.mxu1 %v2915_v0 }
 0x427   : > { %2348 = vmatmul.mubr.msk.f32.gmra.mrb[44].mxu1 %vm1425_vm2, %v2340_v61 }
 0x428   : > { %2573 = vmatprep.mubr.msk.f32.mxu1 %vm1425_vm2, %v2353_v28 }
 0x4ba   : > { %v2561_v19 = vpop.f32.mrb[40].mxu0 }
 0x4bb   : > { %v1599_v23 = vadd.f32 %v2561_v19, %v1413_v29  ;;  %v1593_v31 = vpop.f32.mrb[41].mxu0 }
 0x4bc   : > { %v1594_v32 = vadd.f32 %v1593_v31, %v1408_v30 }
 0x4bd   : > { %v1617_v33 = vmax.f32 %v1599_v23, 0.0 }
 0x4be   : > { %v1614_v36 = vmax.f32 %v1594_v32, 0.0  ;;  %v2564_v34 = vpop.f32.mrb[42].mxu0 }
 0x4bf   : > { %v1609_v39 = vadd.f32 %v2564_v34, %v1423_v35  ;;  %v1603_v37 = vpop.f32.mrb[43].mxu0  ;;  %v2917_v34 = vmov 0.0|0.0  }
 0x4c0   : > { %v2734_v18 = vpack.c.bf16 %v1617_v33, %v1614_v36  ;;  %v1604_v40 = vadd.f32 %v1603_v37, %v1418_v38  ;;  %v1813_v37 = vpop.permute.xlu0 %1812 }
 0x4c1   : > { %v1623_v41 = vmax.f32 %v1609_v39, 0.0 }
 0x4c2   : > { %v1620_v42 = vmax.f32 %v1604_v40, 0.0  ;;  %2735 = vmatprep.subr.bf16.mxu1 %v2734_v18 }
 0x4c3   : > { %2737 = vmatpush3.bf16.msra.mxu1 %v2734_v18 }
 0x4c4   : > { %v2738_v43 = vpack.c.bf16 %v1623_v41, %v1620_v42 }
 0x4c6   : > { %2739 = vmatprep.subr.bf16.mxu1 %v2738_v43 }
 0x4c7   : > { %2741 = vmatpush3.bf16.msra.mxu1 %v2738_v43 }
 0x4ca   : > { %2574 = vmatmul.mubr.msk.f32.vlgmr.msra.gmra.mrb[46].mxu1 %vm1425_vm2, %v2354_v44 }
 0x4cb   : > { %2580 = vmatprep.mubr.msk.f32.mxu1 %vm1820_vm3, %v2361_v12 }
 0x4ee   : > { %v1504_v45 = vpop.f32.mrb[38].mxu1 }
 0x4ef   : > { %v1506_v46 = vpop.f32.mrb[39].mxu1  ;;  %v1505_v47 = vadd.f32 %v1504_v45, %v1408_v30  ;;  %v2369_v45 = vld [vmem:[%s3464_s1 + $0x1c0] sm:$0xff] }
 0x4f0   : > { %v1507_v48 = vadd.f32 %v1506_v46, %v1408_v30 }
 0x4f1   : > { %v1612_v53 = vmax.f32 %v1505_v47, 0.0 }
 0x4f2   : > { %v1510_v49 = vpop.f32.mrb[40].mxu1  ;;  %v1613_v55 = vmax.f32 %v1507_v48, 0.0 }
 0x4f3   : > { %v1511_v50 = vadd.f32 %v1510_v49, %v1413_v29  ;;  %v1512_v51 = vpop.f32.mrb[41].mxu1 }
 0x4f4   : > { %v1513_v52 = vadd.f32 %v1512_v51, %v1413_v29 }
 0x4f5   : > { %v1615_v54 = vmax.f32 %v1511_v50, 0.0 }
 0x4f6   : > { %v1616_v56 = vmax.f32 %v1513_v52, 0.0  ;;  %v1516_v57 = vpop.f32.mrb[42].mxu1 }
 0x4f7   : > { %v2728_v59 = vpack.c.bf16 %v1615_v54, %v1612_v53  ;;  %v1518_v61 = vpop.f32.mrb[43].mxu1  ;;  %v1517_v62 = vadd.f32 %v1516_v57, %v1418_v38 }
 0x4f8   : > { %v2726_v60 = vpack.c.bf16 %v1616_v56, %v1613_v55  ;;  %v1519_v63 = vadd.f32 %v1518_v61, %v1418_v38  ;;  %v1818_v38 = vpop.permute.xlu1 %1817  ;;  %v1992_v61 = vpop.permute.xlu0 %1991 }
 0x4f9   : > { %v1618_v4 = vmax.f32 %v1517_v62, 0.0 }
 0x4fa   : > { %v1522_v1 = vpop.f32.mrb[44].mxu1  ;;  %2727 = vmatprep.subr.bf16.mxu0 %v2726_v60  ;;  %v1619_v7 = vmax.f32 %v1519_v63, 0.0 }
 0x4fb   : > { %v1523_v2 = vadd.f32 %v1522_v1, %v1423_v35  ;;  %v1524_v58 = vpop.f32.mrb[45].mxu1  ;;  %2729 = vmatpush1.bf16.msra.mxu0 %v2728_v59 }
 0x4fc   : > { %v1525_v3 = vadd.f32 %v1524_v58, %v1423_v35 }
 0x4fd   : > { %v1621_v5 = vmax.f32 %v1523_v2, 0.0 }
 0x4fe   : > { %v1622_v8 = vmax.f32 %v1525_v3, 0.0 }
 0x4ff   : > { %v2732_v10 = vpack.c.bf16 %v1621_v5, %v1618_v4 }
 0x500   : > { %v2730_v11 = vpack.c.bf16 %v1622_v8, %v1619_v7 }
 0x502   : > { %2731 = vmatprep.subr.bf16.mxu0 %v2730_v11 }
 0x503   : > { %2733 = vmatpush1.bf16.msra.mxu0 %v2732_v10 }
 0x506   : > { %2357 = vmatmul.mubr.msk.f32.vlgmr.msra.gmra.mrb[44].mxu0 %vm1425_vm2, %v2353_v28 }
 0x507   : > { %1716 = vmatprep.mubr.f32.mxu0 %v2915_v0 }
 0x50a   : > { %2358 = vmatmul.mubr.msk.f32.gmra.mrb[46].mxu0 %vm1425_vm2, %v2354_v44 }
 0x50b   : > { %1891 = vmatprep.mubr.f32.mxu0 %v2915_v0 }
 0x59d   : > { %v2575_v14 = vpop.f32.mrb[46].mxu1 }
 0x59e   : > { %v1795_v16 = vadd.f32 %v2575_v14, %v1638_v13  ;;  %v1789_v17 = vpop.f32.mrb[47].mxu1 }
 0x59f   : > { %v1790_v20 = vadd.f32 %v1789_v17, %v1633_v15 }
 0x5a0   : > { %v1803_v9 = vmax.f32 %v1795_v16, 0.0 }
 0x5a1   : > { %v1800_v21 = vmax.f32 %v1790_v20, 0.0 }
 0x5a3   : > { %v2746_v24 = vpack.c.bf16 %v1803_v9, %v1800_v21 }
 0x5a5   : > { %2747 = vmatprep.subr.bf16.mxu1 %v2746_v24 }
 0x5a6   : > { %2749 = vmatpush3.bf16.msra.mxu1 %v2746_v24 }
 0x5a9   : > { %2581 = vmatmul.mubr.msk.f32.vlgmr.msra.gmra.mrb[48].mxu1 %vm1820_vm3, %v2362_v25 }
 0x5aa   : > { %2061 = vmatprep.mubr.f32.mxu1 %v2915_v0 }
 0x5d9   : > { %v1712_v6 = vpop.f32.mrb[44].mxu0 }
 0x5da   : > { %v1714_v22 = vpop.f32.mrb[45].mxu0  ;;  %v1713_v26 = vadd.f32 %v1712_v6, %v1633_v15 }
 0x5db   : > { %v1715_v27 = vadd.f32 %v1714_v22, %v1633_v15 }
 0x5dc   : > { %v1798_v23 = vmax.f32 %v1713_v26, 0.0 }
 0x5dd   : > { %v1718_v28 = vpop.f32.mrb[46].mxu0  ;;  %v1799_v32 = vmax.f32 %v1715_v27, 0.0 }
 0x5de   : > { %v1719_v29 = vadd.f32 %v1718_v28, %v1638_v13  ;;  %v1720_v30 = vpop.f32.mrb[47].mxu0 }
 0x5df   : > { %v1721_v19 = vadd.f32 %v1720_v30, %v1638_v13 }
 0x5e0   : > { %v1801_v31 = vmax.f32 %v1719_v29, 0.0 }
 0x5e1   : > { %v1802_v33 = vmax.f32 %v1721_v19, 0.0 }
 0x5e2   : > { %v2744_v35 = vpack.c.bf16 %v1801_v31, %v1798_v23 }
 0x5e3   : > { %v2742_v36 = vpack.c.bf16 %v1802_v33, %v1799_v32 }
 0x5e5   : > { %2743 = vmatprep.subr.bf16.mxu0 %v2742_v36 }
 0x5e6   : > { %2745 = vmatpush1.bf16.msra.mxu0 %v2744_v35 }
 0x5e7   : > { %2754 = vmatprep.subr.bf16.mxu0 %v2917_v34 }
 0x5e9   : > { %2365 = vmatmul.mubr.msk.f32.vlgmr.msra.gmra.mrb[48].mxu0 %vm1820_vm3, %v2361_v12 }
 0x5ea   : > { %1897 = vmatprep.mubr.f32.mxu0 %v2915_v0 }
 0x5ed   : > { %2366 = vmatmul.mubr.msk.f32.gmra.mrb[50].mxu0 %vm1820_vm3, %v2362_v25 }
 0x5ee   : > { %2587 = vmatprep.mubr.msk.f32.mxu0 %vm2918_vm4, %v2915_v0 }
 0x67c   : > { %v2582_v39 = vpop.f32.mrb[48].mxu1 }
 0x67d   : > { %v1976_v18 = vadd.f32 %v2582_v39, %v1818_v38  ;;  %v1970_v40 = vpop.f32.mrb[49].mxu1 }
 0x67e   : > { %v1971_v41 = vadd.f32 %v1970_v40, %v1813_v37 }
 0x67f   : > { %v1984_v42 = vmax.f32 %v1976_v18, 0.0 }
 0x680   : > { %v1981_v43 = vmax.f32 %v1971_v41, 0.0 }
 0x682   : > { %v2755_v44 = vpack.c.bf16 %v1984_v42, %v1981_v43 }
 0x684   : > { %2756 = vmatpush3.bf16.msra.mxu0 %v2755_v44 }
 0x687   : > { %2588 = vmatmul.mubr.msk.f32.vlgmr.msra.gmra.mrb[52].mxu0 %vm1820_vm3, %v2369_v45 }
 0x6bc   : > { %v1893_v46 = vpop.f32.mrb[48].mxu0 }
 0x6bd   : > { %v1895_v47 = vpop.f32.mrb[49].mxu0  ;;  %v1894_v0 = vadd.f32 %v1893_v46, %v1813_v37 }
 0x6be   : > { %v1896_v48 = vadd.f32 %v1895_v47, %v1813_v37 }
 0x6bf   : > { %v1979_v53 = vmax.f32 %v1894_v0, 0.0 }
 0x6c0   : > { %v1899_v49 = vpop.f32.mrb[50].mxu0  ;;  %v1980_v55 = vmax.f32 %v1896_v48, 0.0 }
 0x6c1   : > { %v1900_v50 = vadd.f32 %v1899_v49, %v1818_v38  ;;  %v1901_v51 = vpop.f32.mrb[51].mxu0 }
 0x6c2   : > { %v1902_v52 = vadd.f32 %v1901_v51, %v1818_v38 }
 0x6c3   : > { %v1982_v54 = vmax.f32 %v1900_v50, 0.0 }
 0x6c4   : > { %v1983_v56 = vmax.f32 %v1902_v52, 0.0 }
 0x6c5   : > { %v2752_v57 = vpack.c.bf16 %v1982_v54, %v1979_v53 }
 0x6c6   : > { %v2750_v59 = vpack.c.bf16 %v1983_v56, %v1980_v55 }
 0x6c8   : > { %2751 = vmatprep.subr.bf16.mxu1 %v2750_v59 }
 0x6c9   : > { %2753 = vmatpush1.bf16.msra.mxu1 %v2752_v57 }
 0x6cc   : > { %2371 = vmatmul.mubr.msk.f32.vlgmr.msra.gmra.mrb[50].mxu1 %vm1820_vm3, %v2369_v45 }
 0x75a   : > { %v2134_v60 = vpop.f32.mrb[52].mxu0 }
 0x75b   : > { %v2135_v62 = vadd.f32 %v2134_v60, %v1992_v61  ;;  %v2589_v63 = vpop.f32.mrb[53].mxu0 }
 0x75d   : > { %2824 = vtanh.f32 %v2135_v62 }
 0x767   : > { %v2825_v1 = vpop.eup %2824 }
 0x768   : > { %2146 = vst [vmem:[%s217_s5 + $0x8] sm:$0x7] %v2825_v1 }
 0x79f   : > { %v2063_v2 = vpop.f32.mrb[50].mxu1 }
 0x7a0   : > { %v2064_v58 = vadd.f32 %v2063_v2, %v1992_v61  ;;  %v2065_v3 = vpop.f32.mrb[51].mxu1 }
 0x7a1   : > { %v2066_v4 = vadd.f32 %v2065_v3, %v1992_v61 }
 0x7a2   : > { %2826 = vtanh.f32 %v2064_v58 }
 0x7a3   : > { %2828 = vtanh.f32 %v2066_v4 }
 0x7ac   : > { %v2827_v5 = vpop.eup %2826 }
 0x7ad   : > { %v2829_v7 = vpop.eup %2828 }
 0x7ae   : > { %v2143_v8 = vcombine.low %v2827_v5, %v2829_v7 }
 0x7b0   : > { %2145 = vst [vmem:[%s217_s5] sm:$0x77] %v2143_v8 }
 0x7b1 PF: > { %s16_s17 = sadd.s32 1, %s2910_s17   ;;  %s3469_s12 = smov %s2894_s13 }
 0x7b2   : > { %p13_p9 = scmp.ge.s32.totalorder %s16_s17, 4   ;;  %s3470_s13 = smov %s2898_s14 }
 0x7b3   : > { %s3471_s14 = smov %s2984_s23  ;;  %s3472_s15 = smov %s2906_s16 }
 0x7b4   : > { %s3473_s16 = smov %s3475_s19  ;;  %15 = sbr.rel (!%p13_p9) target bundleno = 4 (0x4), region = 86 }
 0x7bb   :  { %2177 = vsyncpa [#allocation3], 1 }
 0x7bc   :  { %2179 = vsyncpa [#allocation3 + $0x1], 1 }

</bundles_post_ra>
